<compile_context>
chip_gen: v7x
topology: tpu7x:2x2x1
jax: 0.10.0
libtpu: 0.0.40
codegen_flags: <defaults>
</compile_context>

<pallas_src>
import jax
import jax.numpy as jnp
from jax import lax
from jax.experimental import pallas as pl
from jax.experimental.pallas import tpu as pltpu


# --------------------------------------------------------------------------------------
# Tiling helper: largest multiple-of-128 tile <= max_tile that divides Nu (or Nu itself).
#   max_tile ~ 512 is a good default for v7x (64 MiB VMEM); ~1024 works on v6e/v5e.
# --------------------------------------------------------------------------------------
def _pick_tile(n, max_tile):
    if n <= max_tile:
        return n
    for t in range(max_tile - max_tile % 128, 0, -128):
        if t > 0 and n % t == 0:
            return t
    return n


# --------------------------------------------------------------------------------------
# Fused PointnetFPModule kernel (channels-first).
#   fuse_mlp=True additionally runs the two SharedMLP layers on the known-side features
#   (this is the fp1 stage, whose known features are the mlp1/mlp2 output).
# --------------------------------------------------------------------------------------
def _make_fp_kernel(fuse_mlp):
    def kernel(u_ref, uu_ref, k_ref, kk_ref, kf_ref, sk_ref, *args):
        if fuse_mlp:
            (m1w_ref, m1b_ref, m2w_ref, m2b_ref,
             wa_ref, wb_ref, b1_ref, w2_ref, b2_ref, o_ref) = args
        else:
            (wa_ref, wb_ref, b1_ref, w2_ref, b2_ref, o_ref) = args

        u = u_ref[0]                          # (Tn, 3) f32  query ("unknown") points
        k = k_ref[0]                          # (Nk, 3) f32  known (coarse) points
        Nk = k.shape[0]

        # ---- squared pairwise distances, transposed: d[j, i] = ||k_j - u_i||^2 ----
        cross = lax.dot_general(k, u, (((1,), (1,)), ((), ())),
                                preferred_element_type=jnp.float32)       # (Nk, Tn)
        d = jnp.maximum(kk_ref[0] + uu_ref[0] - 2.0 * cross, 0.0)          # (Nk, Tn)

        # ---- 3-NN selection on squared distance; sqrt only on selected minima ----
        row = lax.broadcasted_iota(jnp.int32, d.shape, 0)
        wsum = jnp.zeros((1, d.shape[1]), jnp.float32)
        wmatT = jnp.zeros_like(d)
        for _ in range(3):                    # unrolled at trace time
            m2 = jnp.min(d, axis=0, keepdims=True)                         # (1, Tn)
            sel = jnp.min(jnp.where(d == m2, row, Nk), axis=0, keepdims=True)
            hit = row == sel                                               # first argmin
            w = 1.0 / (jnp.sqrt(m2) + 1e-8)   # matches three_nn / three_interpolate
            wsum = wsum + w
            wmatT = wmatT + jnp.where(hit, w, 0.0)
            d = jnp.where(hit, jnp.float32(1e30), d)
        wmatT = wmatT / wsum                  # normalized inv-distance weights (Nk, Tn)

        # ---- known-side (coarse) features, channels-first ----
        if fuse_mlp:
            xc = kf_ref[0].astype(jnp.float32)                             # (dim, Nk)
            h1 = jnp.maximum(
                jnp.dot(m1w_ref[...], xc, preferred_element_type=jnp.float32)
                + m1b_ref[...], 0.0)
            kfc = jnp.maximum(
                jnp.dot(m2w_ref[...], h1, preferred_element_type=jnp.float32)
                + m2b_ref[...], 0.0)                                       # (ctx, Nk)
        else:
            kfc = kf_ref[0].astype(jnp.float32)                            # (ctx, Nk)

        # reassociated: apply W1a on the coarse level (Nk), then interpolate to Tn points
        kproj = jnp.dot(wa_ref[...], kfc, preferred_element_type=jnp.float32)   # (ctx, Nk)
        interp = jnp.dot(kproj, wmatT, preferred_element_type=jnp.float32)      # (ctx, Tn)

        # skip path: adapter Linear is pre-folded into w1b'  (consumes raw NCW features)
        skip = jnp.dot(wb_ref[...], sk_ref[0].astype(jnp.float32),
                       preferred_element_type=jnp.float32)                 # (ctx, Tn)

        h = jnp.maximum(interp + skip + b1_ref[...], 0.0)                  # (ctx, Tn)
        y = jnp.maximum(
            jnp.dot(w2_ref[...], h, preferred_element_type=jnp.float32) + b2_ref[...], 0.0)
        o_ref[0] = y.astype(o_ref.dtype)      # lane-dense store: lanes = point dim
    return kernel


def fp_module(u_xyz, k_xyz, kfeat_c, skip_c, weights, *, fuse_mlp, max_tile=512):
    """One PointnetFPModule stage. All feature tensors are channels-first (B, C, N)."""
    B, Nu, _ = u_xyz.shape
    Nk = k_xyz.shape[1]
    Ck = kfeat_c.shape[1]
    Cs = skip_c.shape[1]
    ctx = weights[-1].shape[0]                # b2 is (ctx, 1)
    Tn = _pick_tile(Nu, max_tile)
    nt = Nu // Tn

    # per-point squared norms, computed once in XLA, reused by every Nu-tile
    uu = jnp.sum(u_xyz * u_xyz, axis=-1)[:, None, :]      # (B, 1, Nu)
    kk = jnp.sum(k_xyz * k_xyz, axis=-1, keepdims=True)   # (B, Nk, 1)

    in_specs = [
        pl.BlockSpec((1, Tn, 3),  lambda b, j: (b, j, 0)),   # query xyz (tiled)
        pl.BlockSpec((1, 1, Tn),  lambda b, j: (b, 0, j)),   # uu        (tiled)
        pl.BlockSpec((1, Nk, 3),  lambda b, j: (b, 0, 0)),   # known xyz (resident)
        pl.BlockSpec((1, Nk, 1),  lambda b, j: (b, 0, 0)),   # kk        (resident)
        pl.BlockSpec((1, Ck, Nk), lambda b, j: (b, 0, 0)),   # known feats (resident)
        pl.BlockSpec((1, Cs, Tn), lambda b, j: (b, 0, j)),   # skip feats  (tiled)
    ]
    # all weights / biases are 2-D, full blocks, constant index
    in_specs += [pl.BlockSpec(w.shape, lambda b, j: (0, 0)) for w in weights]

    return pl.pallas_call(
        _make_fp_kernel(fuse_mlp),
        out_shape=jax.ShapeDtypeStruct((B, ctx, Nu), jnp.float32),
        grid=(B, nt),
        in_specs=in_specs,
        out_specs=pl.BlockSpec((1, ctx, Tn), lambda b, j: (b, 0, j)),
        compiler_params=pltpu.CompilerParams(
            dimension_semantics=("parallel", "parallel"),
            vmem_limit_bytes=64 * 1024 * 1024),   # raise above the 16/32 MiB scoped default
    )(u_xyz, uu, k_xyz, kk, kfeat_c, skip_c, *weights)


# --------------------------------------------------------------------------------------
# Parameter construction (deterministic, in-script).  Raw params use native PyTorch
# layouts ((Cout, Cin) weights); prepare_kernel_params() derives the folded kernel params.
# --------------------------------------------------------------------------------------
def _fold_conv_bn(w_conv, gamma, beta, mean, var, eps=1e-5):
    scale = gamma / jnp.sqrt(var + eps)
    return w_conv * scale[:, None], beta - scale * mean          # (Cout,Cin), (Cout,)


def _conv_bn_block(key, cin, cout):
    w_conv = jax.random.normal(key, (cout, cin), jnp.float32) * jnp.sqrt(2.0 / cin)
    return _fold_conv_bn(w_conv, jnp.ones((cout,), jnp.float32),
                         jnp.zeros((cout,), jnp.float32),
                         jnp.zeros((cout,), jnp.float32),
                         jnp.ones((cout,), jnp.float32))


def _kaiming_uniform_linear(key, cin, cout):
    bound = jnp.sqrt(3.0 / cin)                                   # kaiming_uniform_, a=1
    w = jax.random.uniform(key, (cout, cin), jnp.float32, -bound, bound)
    return w, jnp.zeros((cout,), jnp.float32)


def init_params(key, dim, ctx):
    ks = jax.random.split(key, 8)
    P = {}
    P["mlp1_w"], P["mlp1_b"] = _conv_bn_block(ks[0], dim, dim)
    P["mlp2_w"], P["mlp2_b"] = _conv_bn_block(ks[1], dim, ctx)
    P["ad1_w"], P["ad1_b"] = _kaiming_uniform_linear(ks[2], 3, ctx)
    P["ad2_w"], P["ad2_b"] = _kaiming_uniform_linear(ks[3], 128, ctx)
    for name, k1, k2 in (("fp1", ks[4], ks[5]), ("fp2", ks[6], ks[7])):
        P[f"{name}_w1"], P[f"{name}_b1"] = _conv_bn_block(k1, 2 * ctx, ctx)   # (ctx, 2ctx)
        P[f"{name}_w2"], P[f"{name}_b2"] = _conv_bn_block(k2, ctx, ctx)
    return P


def prepare_kernel_params(P, ctx):
    """Split each FP w1 into [interp | skip] halves and fold the adapter Linear into the
    skip half; biases become (C, 1) columns for channels-first broadcasting."""
    KP = {
        "m1w": P["mlp1_w"], "m1b": P["mlp1_b"][:, None],
        "m2w": P["mlp2_w"], "m2b": P["mlp2_b"][:, None],
    }
    for name, adw, adb in (("fp1", P["ad2_w"], P["ad2_b"]),
                           ("fp2", P["ad1_w"], P["ad1_b"])):
        W1 = P[f"{name}_w1"]                       # (ctx, 2ctx): [interp | skip] along Cin
        Wa, Wb = W1[:, :ctx], W1[:, ctx:]
        KP[f"{name}_wa"] = Wa                                        # (ctx, ctx)
        KP[f"{name}_wb"] = Wb @ adw                                  # adapter folded
        KP[f"{name}_b1"] = (P[f"{name}_b1"] + Wb @ adb)[:, None]     # (ctx, 1)
        KP[f"{name}_w2"] = P[f"{name}_w2"]
        KP[f"{name}_b2"] = P[f"{name}_b2"][:, None]
    return KP


# --------------------------------------------------------------------------------------
# Full forward.  Everything stays in PyTorch's native NCW layout end to end:
#   x (B,dim,N2), saX_features (B,C,NX)  ->  output (B, ctx, N0)   (no transposes).
# --------------------------------------------------------------------------------------
def mask_head_forward(x, end_points, KP, *, max_tile=512):
    # bulky point-feature tensors travel as bf16 (memory-bound); xyz stays f32
    x_bf = x.astype(jnp.bfloat16)
    s1_bf = end_points["sa1_features"].astype(jnp.bfloat16)
    s0_bf = end_points["sa0_features"].astype(jnp.bfloat16)

    fp1_w = (KP["m1w"], KP["m1b"], KP["m2w"], KP["m2b"],
             KP["fp1_wa"], KP["fp1_wb"], KP["fp1_b1"], KP["fp1_w2"], KP["fp1_b2"])
    y1 = fp_module(end_points["sa1_xyz"], end_points["sa2_xyz"], x_bf, s1_bf,
                   fp1_w, fuse_mlp=True, max_tile=max_tile)          # (B, ctx, N1)

    fp2_w = (KP["fp2_wa"], KP["fp2_wb"], KP["fp2_b1"], KP["fp2_w2"], KP["fp2_b2"])
    y2 = fp_module(end_points["sa0_xyz"], end_points["sa1_xyz"], y1, s0_bf,
                   fp2_w, fuse_mlp=False, max_tile=max_tile)         # (B, ctx, N0)
    return y2


# --------------------------------------------------------------------------------------
# Pure-JAX reference (original, unfolded association) for correctness checking.
# --------------------------------------------------------------------------------------
def _ref_three_nn_weights(u_xyz, k_xyz):
    d2 = jnp.sum((u_xyz[:, :, None, :] - k_xyz[:, None, :, :]) ** 2, axis=-1)
    dist = jnp.sqrt(jnp.maximum(d2, 0.0))
    B, Nu, Nk = dist.shape
    col = jnp.arange(Nk, dtype=jnp.int32)[None, None, :]
    d = dist
    wsum = jnp.zeros((B, Nu, 1), jnp.float32)
    wmat = jnp.zeros((B, Nu, Nk), jnp.float32)
    for _ in range(3):
        mval = jnp.min(d, axis=-1, keepdims=True)
        sel = jnp.min(jnp.where(d == mval, col, Nk), axis=-1, keepdims=True)
        onehot = (col == sel).astype(jnp.float32)
        w = 1.0 / (mval + 1e-8)
        wsum += w
        wmat += onehot * w
        d = jnp.where(onehot > 0.0, 1e30, d)
    return wmat / wsum


def ref_forward(x, ep, P):
    relu = lambda v: jnp.maximum(v, 0.0)
    bf = lambda a: a.astype(jnp.bfloat16).astype(jnp.float32)   # mirrors bf16 feature inputs

    xt = jnp.transpose(bf(x), (0, 2, 1))
    xf = relu(relu(xt @ P["mlp1_w"].T + P["mlp1_b"]) @ P["mlp2_w"].T + P["mlp2_b"])
    s0 = jnp.transpose(bf(ep["sa0_features"]), (0, 2, 1)) @ P["ad1_w"].T + P["ad1_b"]
    s1 = jnp.transpose(bf(ep["sa1_features"]), (0, 2, 1)) @ P["ad2_w"].T + P["ad2_b"]

    def fp(u_xyz, k_xyz, ufeat, kfeat, pfx):
        W = _ref_three_nn_weights(u_xyz, k_xyz)
        interp = jnp.matmul(W, kfeat)
        feat = jnp.concatenate([interp, ufeat], axis=-1)
        h = relu(feat @ P[f"{pfx}_w1"].T + P[f"{pfx}_b1"])
        return relu(h @ P[f"{pfx}_w2"].T + P[f"{pfx}_b2"])

    y1 = fp(ep["sa1_xyz"], ep["sa2_xyz"], s1, xf, "fp1")
    y2 = fp(ep["sa0_xyz"], ep["sa1_xyz"], s0, y1, "fp2")
    return jnp.transpose(y2, (0, 2, 1))


# --------------------------------------------------------------------------------------
if __name__ == "__main__":
    B, dim, ctx = 2, 32, 32
    N0, N1, N2 = 64, 32, 16

    key = jax.random.PRNGKey(0)
    ks = jax.random.split(key, 7)
    x = jax.random.normal(ks[0], (B, dim, N2), jnp.float32)                 # PyTorch NCW
    end_points = {
        "sa0_xyz": jax.random.normal(ks[1], (B, N0, 3), jnp.float32),
        "sa1_xyz": jax.random.normal(ks[2], (B, N1, 3), jnp.float32),
        "sa2_xyz": jax.random.normal(ks[3], (B, N2, 3), jnp.float32),
        "sa0_features": jax.random.normal(ks[4], (B, 3, N0), jnp.float32),
        "sa1_features": jax.random.normal(ks[5], (B, 128, N1), jnp.float32),
    }
    P = init_params(ks[6], dim, ctx)          # raw (PyTorch-layout) parameters
    KP = prepare_kernel_params(P, ctx)        # folded / fused kernel parameters

    out = jax.block_until_ready(mask_head_forward(x, end_points, KP))
    assert out.shape == (B, ctx, N0), out.shape

    ref = jax.block_until_ready(ref_forward(x, end_points, P))
    err = float(jnp.max(jnp.abs(out - ref)))
    scale = float(jnp.max(jnp.abs(ref))) + 1e-6
    if err / scale < 2e-3:
        print("KERNEL_OK")
    else:
        raise AssertionError(f"mismatch: max abs err {err}, scale {scale}")
</pallas_src>

<mosaic_0001>
module attributes {stable_mosaic.version = 11 : i64} {
  func.func @kernel(%arg0: i32, %arg1: i32, %arg2: memref<1x32x3xf32, #tpu.memory_space<vmem>>, %arg3: memref<1x1x32xf32, #tpu.memory_space<vmem>>, %arg4: memref<1x16x3xf32, #tpu.memory_space<vmem>>, %arg5: memref<1x16x1xf32, #tpu.memory_space<vmem>>, %arg6: memref<1x32x16xbf16, #tpu.memory_space<vmem>>, %arg7: memref<1x128x32xbf16, #tpu.memory_space<vmem>>, %arg8: memref<32x32xf32, #tpu.memory_space<vmem>>, %arg9: memref<32x1xf32, #tpu.memory_space<vmem>>, %arg10: memref<32x32xf32, #tpu.memory_space<vmem>>, %arg11: memref<32x1xf32, #tpu.memory_space<vmem>>, %arg12: memref<32x32xf32, #tpu.memory_space<vmem>>, %arg13: memref<32x128xf32, #tpu.memory_space<vmem>>, %arg14: memref<32x1xf32, #tpu.memory_space<vmem>>, %arg15: memref<32x32xf32, #tpu.memory_space<vmem>>, %arg16: memref<32x1xf32, #tpu.memory_space<vmem>>, %arg17: memref<1x32x32xf32, #tpu.memory_space<vmem>>) attributes {dimension_semantics = [#tpu.dimension_semantics<parallel>, #tpu.dimension_semantics<parallel>], iteration_bounds = array<i64: 2, 1>, scalar_prefetch = 0 : i64, scratch_operands = 0 : i64, tpu.core_type = #tpu.core_type<tc>, window_params = [{transform_indices = @transform_0, window_bounds = array<i64: 1, 32, 3>}, {transform_indices = @transform_1, window_bounds = array<i64: 1, 1, 32>}, {transform_indices = @transform_2, window_bounds = array<i64: 1, 16, 3>}, {transform_indices = @transform_3, window_bounds = array<i64: 1, 16, 1>}, {transform_indices = @transform_4, window_bounds = array<i64: 1, 32, 16>}, {transform_indices = @transform_5, window_bounds = array<i64: 1, 128, 32>}, {pipeline_mode = #tpu.pipeline_mode<synchronous>, transform_indices = @transform_6, window_bounds = array<i64: 32, 32>}, {pipeline_mode = #tpu.pipeline_mode<synchronous>, transform_indices = @transform_7, window_bounds = array<i64: 32, 1>}, {pipeline_mode = #tpu.pipeline_mode<synchronous>, transform_indices = @transform_8, window_bounds = array<i64: 32, 32>}, {pipeline_mode = #tpu.pipeline_mode<synchronous>, transform_indices = @transform_9, window_bounds = array<i64: 32, 1>}, {pipeline_mode = #tpu.pipeline_mode<synchronous>, transform_indices = @transform_10, window_bounds = array<i64: 32, 32>}, {pipeline_mode = #tpu.pipeline_mode<synchronous>, transform_indices = @transform_11, window_bounds = array<i64: 32, 128>}, {pipeline_mode = #tpu.pipeline_mode<synchronous>, transform_indices = @transform_12, window_bounds = array<i64: 32, 1>}, {pipeline_mode = #tpu.pipeline_mode<synchronous>, transform_indices = @transform_13, window_bounds = array<i64: 32, 32>}, {pipeline_mode = #tpu.pipeline_mode<synchronous>, transform_indices = @transform_14, window_bounds = array<i64: 32, 1>}, {transform_indices = @transform_15, window_bounds = array<i64: 1, 32, 32>}]} {
    %c0 = arith.constant 0 : index
    %c0_0 = arith.constant 0 : index
    %c0_1 = arith.constant 0 : index
    %0 = vector.load %arg2[%c0, %c0_0, %c0_1] : memref<1x32x3xf32, #tpu.memory_space<vmem>>, vector<1x32x3xf32>
    %1 = vector.shape_cast %0 : vector<1x32x3xf32> to vector<32x3xf32>
    %c0_2 = arith.constant 0 : index
    %c0_3 = arith.constant 0 : index
    %c0_4 = arith.constant 0 : index
    %2 = vector.load %arg4[%c0_2, %c0_3, %c0_4] : memref<1x16x3xf32, #tpu.memory_space<vmem>>, vector<1x16x3xf32>
    %3 = vector.shape_cast %2 : vector<1x16x3xf32> to vector<16x3xf32>
    %cst = arith.constant dense<0.000000e+00> : vector<16x32xf32>
    %4 = tpu.matmul %3, %1, %cst {dimension_numbers = #tpu.dot_dimension_numbers<[1], [1], [0], [0], [0, 0, 1, 0], [], []>} : vector<16x3xf32>, vector<32x3xf32>, vector<16x32xf32> -> vector<16x32xf32>
    %c0_5 = arith.constant 0 : index
    %c0_6 = arith.constant 0 : index
    %c0_7 = arith.constant 0 : index
    %5 = vector.load %arg5[%c0_5, %c0_6, %c0_7] : memref<1x16x1xf32, #tpu.memory_space<vmem>>, vector<1x16x1xf32>
    %6 = vector.shape_cast %5 : vector<1x16x1xf32> to vector<16x1xf32>
    %c0_8 = arith.constant 0 : index
    %c0_9 = arith.constant 0 : index
    %c0_10 = arith.constant 0 : index
    %7 = vector.load %arg3[%c0_8, %c0_9, %c0_10] : memref<1x1x32xf32, #tpu.memory_space<vmem>>, vector<1x1x32xf32>
    %8 = vector.shape_cast %7 : vector<1x1x32xf32> to vector<1x32xf32>
    %9 = vector.broadcast %6 : vector<16x1xf32> to vector<16x32xf32>
    %10 = vector.broadcast %8 : vector<1x32xf32> to vector<16x32xf32>
    %11 = arith.addf %9, %10 : vector<16x32xf32>
    %cst_11 = arith.constant 2.000000e+00 : f32
    %12 = vector.broadcast %cst_11 : f32 to vector<16x32xf32>
    %13 = arith.mulf %12, %4 : vector<16x32xf32>
    %14 = arith.subf %11, %13 : vector<16x32xf32>
    %cst_12 = arith.constant 0.000000e+00 : f32
    %15 = vector.broadcast %cst_12 : f32 to vector<16x32xf32>
    %16 = arith.maximumf %14, %15 : vector<16x32xf32>
    %17 = tpu.iota {dimensions = array<i32: 0>} : vector<16x32xi32>
    %cst_13 = arith.constant 0.000000e+00 : f32
    %18 = vector.broadcast %cst_13 : f32 to vector<1x32xf32>
    %cst_14 = arith.constant 0.000000e+00 : f32
    %19 = vector.broadcast %cst_14 : f32 to vector<16x32xf32>
    %cst_15 = arith.constant dense<0x7F800000> : vector<32xf32>
    %20 = vector.multi_reduction <minimumf>, %16, %cst_15 [0] : vector<16x32xf32> to vector<32xf32>
    %21 = vector.shape_cast %20 : vector<32xf32> to vector<1x32xf32>
    %22 = vector.broadcast %21 : vector<1x32xf32> to vector<16x32xf32>
    %23 = arith.cmpf oeq, %16, %22 : vector<16x32xf32>
    %c16_i32 = arith.constant 16 : i32
    %24 = vector.broadcast %c16_i32 : i32 to vector<16x32xi32>
    %25 = arith.select %23, %17, %24 : vector<16x32xi1>, vector<16x32xi32>
    %cst_16 = arith.constant dense<2147483647> : vector<32xi32>
    %26 = vector.multi_reduction <minsi>, %25, %cst_16 [0] : vector<16x32xi32> to vector<32xi32>
    %27 = vector.shape_cast %26 : vector<32xi32> to vector<1x32xi32>
    %28 = vector.broadcast %27 : vector<1x32xi32> to vector<16x32xi32>
    %29 = arith.cmpi eq, %17, %28 : vector<16x32xi32>
    %30 = math.sqrt %21 : vector<1x32xf32>
    %cst_17 = arith.constant 9.99999993E-9 : f32
    %31 = vector.broadcast %cst_17 : f32 to vector<1x32xf32>
    %32 = arith.addf %30, %31 : vector<1x32xf32>
    %cst_18 = arith.constant 1.000000e+00 : f32
    %33 = vector.broadcast %cst_18 : f32 to vector<1x32xf32>
    %34 = arith.divf %33, %32 : vector<1x32xf32>
    %35 = arith.addf %18, %34 : vector<1x32xf32>
    %cst_19 = arith.constant 0.000000e+00 : f32
    %36 = vector.shape_cast %34 : vector<1x32xf32> to vector<1x32xf32>
    %37 = vector.broadcast %36 : vector<1x32xf32> to vector<16x32xf32>
    %38 = vector.broadcast %cst_19 : f32 to vector<16x32xf32>
    %39 = arith.select %29, %37, %38 : vector<16x32xi1>, vector<16x32xf32>
    %40 = arith.addf %19, %39 : vector<16x32xf32>
    %cst_20 = arith.constant 1.000000e+30 : f32
    %41 = vector.broadcast %cst_20 : f32 to vector<16x32xf32>
    %42 = arith.select %29, %41, %16 : vector<16x32xi1>, vector<16x32xf32>
    %cst_21 = arith.constant dense<0x7F800000> : vector<32xf32>
    %43 = vector.multi_reduction <minimumf>, %42, %cst_21 [0] : vector<16x32xf32> to vector<32xf32>
    %44 = vector.shape_cast %43 : vector<32xf32> to vector<1x32xf32>
    %45 = vector.broadcast %44 : vector<1x32xf32> to vector<16x32xf32>
    %46 = arith.cmpf oeq, %42, %45 : vector<16x32xf32>
    %c16_i32_22 = arith.constant 16 : i32
    %47 = vector.broadcast %c16_i32_22 : i32 to vector<16x32xi32>
    %48 = arith.select %46, %17, %47 : vector<16x32xi1>, vector<16x32xi32>
    %cst_23 = arith.constant dense<2147483647> : vector<32xi32>
    %49 = vector.multi_reduction <minsi>, %48, %cst_23 [0] : vector<16x32xi32> to vector<32xi32>
    %50 = vector.shape_cast %49 : vector<32xi32> to vector<1x32xi32>
    %51 = vector.broadcast %50 : vector<1x32xi32> to vector<16x32xi32>
    %52 = arith.cmpi eq, %17, %51 : vector<16x32xi32>
    %53 = math.sqrt %44 : vector<1x32xf32>
    %cst_24 = arith.constant 9.99999993E-9 : f32
    %54 = vector.broadcast %cst_24 : f32 to vector<1x32xf32>
    %55 = arith.addf %53, %54 : vector<1x32xf32>
    %cst_25 = arith.constant 1.000000e+00 : f32
    %56 = vector.broadcast %cst_25 : f32 to vector<1x32xf32>
    %57 = arith.divf %56, %55 : vector<1x32xf32>
    %58 = arith.addf %35, %57 : vector<1x32xf32>
    %cst_26 = arith.constant 0.000000e+00 : f32
    %59 = vector.shape_cast %57 : vector<1x32xf32> to vector<1x32xf32>
    %60 = vector.broadcast %59 : vector<1x32xf32> to vector<16x32xf32>
    %61 = vector.broadcast %cst_26 : f32 to vector<16x32xf32>
    %62 = arith.select %52, %60, %61 : vector<16x32xi1>, vector<16x32xf32>
    %63 = arith.addf %40, %62 : vector<16x32xf32>
    %cst_27 = arith.constant 1.000000e+30 : f32
    %64 = vector.broadcast %cst_27 : f32 to vector<16x32xf32>
    %65 = arith.select %52, %64, %42 : vector<16x32xi1>, vector<16x32xf32>
    %cst_28 = arith.constant dense<0x7F800000> : vector<32xf32>
    %66 = vector.multi_reduction <minimumf>, %65, %cst_28 [0] : vector<16x32xf32> to vector<32xf32>
    %67 = vector.shape_cast %66 : vector<32xf32> to vector<1x32xf32>
    %68 = vector.broadcast %67 : vector<1x32xf32> to vector<16x32xf32>
    %69 = arith.cmpf oeq, %65, %68 : vector<16x32xf32>
    %c16_i32_29 = arith.constant 16 : i32
    %70 = vector.broadcast %c16_i32_29 : i32 to vector<16x32xi32>
    %71 = arith.select %69, %17, %70 : vector<16x32xi1>, vector<16x32xi32>
    %cst_30 = arith.constant dense<2147483647> : vector<32xi32>
    %72 = vector.multi_reduction <minsi>, %71, %cst_30 [0] : vector<16x32xi32> to vector<32xi32>
    %73 = vector.shape_cast %72 : vector<32xi32> to vector<1x32xi32>
    %74 = vector.broadcast %73 : vector<1x32xi32> to vector<16x32xi32>
    %75 = arith.cmpi eq, %17, %74 : vector<16x32xi32>
    %76 = math.sqrt %67 : vector<1x32xf32>
    %cst_31 = arith.constant 9.99999993E-9 : f32
    %77 = vector.broadcast %cst_31 : f32 to vector<1x32xf32>
    %78 = arith.addf %76, %77 : vector<1x32xf32>
    %cst_32 = arith.constant 1.000000e+00 : f32
    %79 = vector.broadcast %cst_32 : f32 to vector<1x32xf32>
    %80 = arith.divf %79, %78 : vector<1x32xf32>
    %81 = arith.addf %58, %80 : vector<1x32xf32>
    %cst_33 = arith.constant 0.000000e+00 : f32
    %82 = vector.shape_cast %80 : vector<1x32xf32> to vector<1x32xf32>
    %83 = vector.broadcast %82 : vector<1x32xf32> to vector<16x32xf32>
    %84 = vector.broadcast %cst_33 : f32 to vector<16x32xf32>
    %85 = arith.select %75, %83, %84 : vector<16x32xi1>, vector<16x32xf32>
    %86 = arith.addf %63, %85 : vector<16x32xf32>
    %87 = vector.broadcast %81 : vector<1x32xf32> to vector<16x32xf32>
    %88 = arith.divf %86, %87 : vector<16x32xf32>
    %c0_34 = arith.constant 0 : index
    %c0_35 = arith.constant 0 : index
    %c0_36 = arith.constant 0 : index
    %89 = vector.load %arg6[%c0_34, %c0_35, %c0_36] : memref<1x32x16xbf16, #tpu.memory_space<vmem>>, vector<1x32x16xbf16>
    %90 = vector.shape_cast %89 : vector<1x32x16xbf16> to vector<32x16xbf16>
    %91 = arith.extf %90 : vector<32x16xbf16> to vector<32x16xf32>
    %c0_37 = arith.constant 0 : index
    %c0_38 = arith.constant 0 : index
    %92 = vector.load %arg8[%c0_37, %c0_38] : memref<32x32xf32, #tpu.memory_space<vmem>>, vector<32x32xf32>
    %cst_39 = arith.constant dense<0.000000e+00> : vector<32x16xf32>
    %93 = tpu.matmul %92, %91, %cst_39 {dimension_numbers = #tpu.dot_dimension_numbers<[1], [0], [0], [1], [0, 0, 1, 1], [], []>} : vector<32x32xf32>, vector<32x16xf32>, vector<32x16xf32> -> vector<32x16xf32>
    %c0_40 = arith.constant 0 : index
    %c0_41 = arith.constant 0 : index
    %94 = vector.load %arg9[%c0_40, %c0_41] : memref<32x1xf32, #tpu.memory_space<vmem>>, vector<32x1xf32>
    %95 = vector.broadcast %94 : vector<32x1xf32> to vector<32x16xf32>
    %96 = arith.addf %93, %95 : vector<32x16xf32>
    %cst_42 = arith.constant 0.000000e+00 : f32
    %97 = vector.broadcast %cst_42 : f32 to vector<32x16xf32>
    %98 = arith.maximumf %96, %97 : vector<32x16xf32>
    %c0_43 = arith.constant 0 : index
    %c0_44 = arith.constant 0 : index
    %99 = vector.load %arg10[%c0_43, %c0_44] : memref<32x32xf32, #tpu.memory_space<vmem>>, vector<32x32xf32>
    %cst_45 = arith.constant dense<0.000000e+00> : vector<32x16xf32>
    %100 = tpu.matmul %99, %98, %cst_45 {dimension_numbers = #tpu.dot_dimension_numbers<[1], [0], [0], [1], [0, 0, 1, 1], [], []>} : vector<32x32xf32>, vector<32x16xf32>, vector<32x16xf32> -> vector<32x16xf32>
    %c0_46 = arith.constant 0 : index
    %c0_47 = arith.constant 0 : index
    %101 = vector.load %arg11[%c0_46, %c0_47] : memref<32x1xf32, #tpu.memory_space<vmem>>, vector<32x1xf32>
    %102 = vector.broadcast %101 : vector<32x1xf32> to vector<32x16xf32>
    %103 = arith.addf %100, %102 : vector<32x16xf32>
    %cst_48 = arith.constant 0.000000e+00 : f32
    %104 = vector.broadcast %cst_48 : f32 to vector<32x16xf32>
    %105 = arith.maximumf %103, %104 : vector<32x16xf32>
    %c0_49 = arith.constant 0 : index
    %c0_50 = arith.constant 0 : index
    %106 = vector.load %arg12[%c0_49, %c0_50] : memref<32x32xf32, #tpu.memory_space<vmem>>, vector<32x32xf32>
    %cst_51 = arith.constant dense<0.000000e+00> : vector<32x16xf32>
    %107 = tpu.matmul %106, %105, %cst_51 {dimension_numbers = #tpu.dot_dimension_numbers<[1], [0], [0], [1], [0, 0, 1, 1], [], []>} : vector<32x32xf32>, vector<32x16xf32>, vector<32x16xf32> -> vector<32x16xf32>
    %cst_52 = arith.constant dense<0.000000e+00> : vector<32x32xf32>
    %108 = tpu.matmul %107, %88, %cst_52 {dimension_numbers = #tpu.dot_dimension_numbers<[1], [0], [0], [1], [0, 0, 1, 1], [], []>} : vector<32x16xf32>, vector<16x32xf32>, vector<32x32xf32> -> vector<32x32xf32>
    %c0_53 = arith.constant 0 : index
    %c0_54 = arith.constant 0 : index
    %109 = vector.load %arg13[%c0_53, %c0_54] : memref<32x128xf32, #tpu.memory_space<vmem>>, vector<32x128xf32>
    %c0_55 = arith.constant 0 : index
    %c0_56 = arith.constant 0 : index
    %c0_57 = arith.constant 0 : index
    %110 = vector.load %arg7[%c0_55, %c0_56, %c0_57] : memref<1x128x32xbf16, #tpu.memory_space<vmem>>, vector<1x128x32xbf16>
    %111 = vector.shape_cast %110 : vector<1x128x32xbf16> to vector<128x32xbf16>
    %112 = arith.extf %111 : vector<128x32xbf16> to vector<128x32xf32>
    %cst_58 = arith.constant dense<0.000000e+00> : vector<32x32xf32>
    %113 = tpu.matmul %109, %112, %cst_58 {dimension_numbers = #tpu.dot_dimension_numbers<[1], [0], [0], [1], [0, 0, 1, 1], [], []>} : vector<32x128xf32>, vector<128x32xf32>, vector<32x32xf32> -> vector<32x32xf32>
    %114 = arith.addf %108, %113 : vector<32x32xf32>
    %c0_59 = arith.constant 0 : index
    %c0_60 = arith.constant 0 : index
    %115 = vector.load %arg14[%c0_59, %c0_60] : memref<32x1xf32, #tpu.memory_space<vmem>>, vector<32x1xf32>
    %116 = vector.broadcast %115 : vector<32x1xf32> to vector<32x32xf32>
    %117 = arith.addf %114, %116 : vector<32x32xf32>
    %cst_61 = arith.constant 0.000000e+00 : f32
    %118 = vector.broadcast %cst_61 : f32 to vector<32x32xf32>
    %119 = arith.maximumf %117, %118 : vector<32x32xf32>
    %c0_62 = arith.constant 0 : index
    %c0_63 = arith.constant 0 : index
    %120 = vector.load %arg15[%c0_62, %c0_63] : memref<32x32xf32, #tpu.memory_space<vmem>>, vector<32x32xf32>
    %cst_64 = arith.constant dense<0.000000e+00> : vector<32x32xf32>
    %121 = tpu.matmul %120, %119, %cst_64 {dimension_numbers = #tpu.dot_dimension_numbers<[1], [0], [0], [1], [0, 0, 1, 1], [], []>} : vector<32x32xf32>, vector<32x32xf32>, vector<32x32xf32> -> vector<32x32xf32>
    %c0_65 = arith.constant 0 : index
    %c0_66 = arith.constant 0 : index
    %122 = vector.load %arg16[%c0_65, %c0_66] : memref<32x1xf32, #tpu.memory_space<vmem>>, vector<32x1xf32>
    %123 = vector.broadcast %122 : vector<32x1xf32> to vector<32x32xf32>
    %124 = arith.addf %121, %123 : vector<32x32xf32>
    %cst_67 = arith.constant 0.000000e+00 : f32
    %125 = vector.broadcast %cst_67 : f32 to vector<32x32xf32>
    %126 = arith.maximumf %124, %125 : vector<32x32xf32>
    %c0_68 = arith.constant 0 : index
    %c0_69 = arith.constant 0 : index
    %c0_70 = arith.constant 0 : index
    %127 = vector.load %arg17[%c0_68, %c0_69, %c0_70] : memref<1x32x32xf32, #tpu.memory_space<vmem>>, vector<1x32x32xf32>
    %128 = vector.shape_cast %127 : vector<1x32x32xf32> to vector<32x32xf32>
    %129 = vector.shape_cast %126 : vector<32x32xf32> to vector<1x32x32xf32>
    tpu.vector_store %arg17[%c0_68, %c0_69, %c0_70], %129 {strides = array<i32>} : memref<1x32x32xf32, #tpu.memory_space<vmem>>, vector<1x32x32xf32>,
    return
  }
  func.func @transform_0(%arg0: i32, %arg1: i32) -> (i32, i32, i32) {
    %c0_i32 = arith.constant 0 : i32
    %c0_i32_0 = arith.constant 0 : i32
    return %arg0, %arg1, %c0_i32 : i32, i32, i32
  }
  func.func @transform_1(%arg0: i32, %arg1: i32) -> (i32, i32, i32) {
    %c0_i32 = arith.constant 0 : i32
    %c0_i32_0 = arith.constant 0 : i32
    return %arg0, %c0_i32, %arg1 : i32, i32, i32
  }
  func.func @transform_2(%arg0: i32, %arg1: i32) -> (i32, i32, i32) {
    %c0_i32 = arith.constant 0 : i32
    %c0_i32_0 = arith.constant 0 : i32
    %c0_i32_1 = arith.constant 0 : i32
    return %arg0, %c0_i32, %c0_i32_0 : i32, i32, i32
  }
  func.func @transform_3(%arg0: i32, %arg1: i32) -> (i32, i32, i32) {
    %c0_i32 = arith.constant 0 : i32
    %c0_i32_0 = arith.constant 0 : i32
    %c0_i32_1 = arith.constant 0 : i32
    return %arg0, %c0_i32, %c0_i32_0 : i32, i32, i32
  }
  func.func @transform_4(%arg0: i32, %arg1: i32) -> (i32, i32, i32) {
    %c0_i32 = arith.constant 0 : i32
    %c0_i32_0 = arith.constant 0 : i32
    %c0_i32_1 = arith.constant 0 : i32
    return %arg0, %c0_i32, %c0_i32_0 : i32, i32, i32
  }
  func.func @transform_5(%arg0: i32, %arg1: i32) -> (i32, i32, i32) {
    %c0_i32 = arith.constant 0 : i32
    %c0_i32_0 = arith.constant 0 : i32
    return %arg0, %c0_i32, %arg1 : i32, i32, i32
  }
  func.func @transform_6(%arg0: i32, %arg1: i32) -> (i32, i32) {
    %c0_i32 = arith.constant 0 : i32
    %c0_i32_0 = arith.constant 0 : i32
    %c0_i32_1 = arith.constant 0 : i32
    return %c0_i32, %c0_i32_0 : i32, i32
  }
  func.func @transform_7(%arg0: i32, %arg1: i32) -> (i32, i32) {
    %c0_i32 = arith.constant 0 : i32
    %c0_i32_0 = arith.constant 0 : i32
    %c0_i32_1 = arith.constant 0 : i32
    return %c0_i32, %c0_i32_0 : i32, i32
  }
  func.func @transform_8(%arg0: i32, %arg1: i32) -> (i32, i32) {
    %c0_i32 = arith.constant 0 : i32
    %c0_i32_0 = arith.constant 0 : i32
    %c0_i32_1 = arith.constant 0 : i32
    return %c0_i32, %c0_i32_0 : i32, i32
  }
  func.func @transform_9(%arg0: i32, %arg1: i32) -> (i32, i32) {
    %c0_i32 = arith.constant 0 : i32
    %c0_i32_0 = arith.constant 0 : i32
    %c0_i32_1 = arith.constant 0 : i32
    return %c0_i32, %c0_i32_0 : i32, i32
  }
  func.func @transform_10(%arg0: i32, %arg1: i32) -> (i32, i32) {
    %c0_i32 = arith.constant 0 : i32
    %c0_i32_0 = arith.constant 0 : i32
    %c0_i32_1 = arith.constant 0 : i32
    return %c0_i32, %c0_i32_0 : i32, i32
  }
  func.func @transform_11(%arg0: i32, %arg1: i32) -> (i32, i32) {
    %c0_i32 = arith.constant 0 : i32
    %c0_i32_0 = arith.constant 0 : i32
    %c0_i32_1 = arith.constant 0 : i32
    return %c0_i32, %c0_i32_0 : i32, i32
  }
  func.func @transform_12(%arg0: i32, %arg1: i32) -> (i32, i32) {
    %c0_i32 = arith.constant 0 : i32
    %c0_i32_0 = arith.constant 0 : i32
    %c0_i32_1 = arith.constant 0 : i32
    return %c0_i32, %c0_i32_0 : i32, i32
  }
  func.func @transform_13(%arg0: i32, %arg1: i32) -> (i32, i32) {
    %c0_i32 = arith.constant 0 : i32
    %c0_i32_0 = arith.constant 0 : i32
    %c0_i32_1 = arith.constant 0 : i32
    return %c0_i32, %c0_i32_0 : i32, i32
  }
  func.func @transform_14(%arg0: i32, %arg1: i32) -> (i32, i32) {
    %c0_i32 = arith.constant 0 : i32
    %c0_i32_0 = arith.constant 0 : i32
    %c0_i32_1 = arith.constant 0 : i32
    return %c0_i32, %c0_i32_0 : i32, i32
  }
  func.func @transform_15(%arg0: i32, %arg1: i32) -> (i32, i32, i32) {
    %c0_i32 = arith.constant 0 : i32
    %c0_i32_0 = arith.constant 0 : i32
    return %arg0, %c0_i32, %arg1 : i32, i32, i32
  }
}

</mosaic_0001>

<bundles_post_ra>
// kernel: tpu_custom_call.1
= control target key start
LH: loop header
LB: loop body
LE: loop exit
PB: predicated region body
PF: predicated region fallthrough
CT: control target
= control target key end

     0   :  { %s4176_s0 = inlined_call_operand.hbm [shape: f32[2,32,3], index: 0, kind: input, shape index: {}]   ;;  %s4177_s1 = inlined_call_operand.hbm [shape: f32[2,1,32], index: 1, kind: input, shape index: {}]   ;;  %s4178_s2 = inlined_call_operand.hbm [shape: f32[2,16,3], index: 2, kind: input, shape index: {}]   ;;  %s4179_s3 = inlined_call_operand.hbm [shape: f32[2,16,1], index: 3, kind: input, shape index: {}]   ;;  %s4180_s4 = inlined_call_operand.hbm [shape: bf16[2,32,16], index: 4, kind: input, shape index: {}]   ;;  %s4181_s5 = inlined_call_operand.hbm [shape: bf16[2,128,32], index: 5, kind: input, shape index: {}]   ;;  %s4182_s6 = inlined_call_operand.hbm [shape: f32[32,32], index: 6, kind: input, shape index: {}]   ;;  %s4183_s7 = inlined_call_operand.hbm [shape: f32[32,1], index: 7, kind: input, shape index: {}]   ;;  %s4184_s8 = inlined_call_operand.hbm [shape: f32[32,32], index: 8, kind: input, shape index: {}]   ;;  %s4185_s9 = inlined_call_operand.hbm [shape: f32[32,1], index: 9, kind: input, shape index: {}]   ;;  %s4186_s10 = inlined_call_operand.hbm [shape: f32[32,32], index: 10, kind: input, shape index: {}]   ;;  %s4187_s11 = inlined_call_operand.hbm [shape: f32[32,128], index: 11, kind: input, shape index: {}]   ;;  %s4188_s12 = inlined_call_operand.hbm [shape: f32[32,1], index: 12, kind: input, shape index: {}]   ;;  %s4189_s13 = inlined_call_operand.hbm [shape: f32[32,32], index: 13, kind: input, shape index: {}]   ;;  %s4190_s14 = inlined_call_operand.hbm [shape: f32[32,1], index: 14, kind: input, shape index: {}]   ;;  %s4191_s15 = inlined_call_operand.hbm [shape: f32[2,32,32], index: 15, kind: output, shape index: {}]  }
   0x1   :  { %4224 = sst [smem:[#allocation45_spill]] %s4176_s0 }
   0x2   :  { %4225 = sst [smem:[#allocation46_spill]] %s4177_s1 }
   0x3   :  { %4226 = sst [smem:[#allocation47_spill]] %s4178_s2 }
   0x4   :  { %4227 = sst [smem:[#allocation48_spill]] %s4179_s3 }
   0x5   :  { %4228 = sst [smem:[#allocation49_spill]] %s4180_s4 }
   0x6   :  { %4229 = sst [smem:[#allocation50_spill]] %s4181_s5 }
   0x7   :  { %4230 = sst [smem:[#allocation51_spill]] %s4182_s6 }
   0x8   :  { %4231 = sst [smem:[#allocation52_spill]] %s4183_s7 }
   0x9   :  { %4232 = sst [smem:[#allocation53_spill]] %s4184_s8 }
   0xa   :  { %4233 = sst [smem:[#allocation54_spill]] %s4185_s9 }
   0xb   :  { %4234 = sst [smem:[#allocation55_spill]] %s4186_s10 }
   0xc   :  { %4235 = sst [smem:[#allocation56_spill]] %s4187_s11 }
   0xd   :  { %4236 = sst [smem:[#allocation57_spill]] %s4188_s12 }
   0xe   :  { %4237 = sst [smem:[#allocation58_spill]] %s4189_s13 }
   0xf   :  { %4238 = sst [smem:[#allocation59_spill]] %s4190_s14 }
  0x10   :  { %4239 = sst [smem:[#allocation60_spill]] %s4191_s15 }
  0x11   :  { %20 = vsyncpa [#allocation3], 0 }
  0x12   :  { %22 = vsyncpa [#allocation3 + $0x1], 0 }
  0x13   :  { %23 = vsyncpa [#allocation6], 0 }
  0x14   :  { %25 = vsyncpa [#allocation6 + $0x1], 0 }
  0x15   :  { %26 = vsyncpa [#allocation9], 0 }
  0x16   :  { %28 = vsyncpa [#allocation9 + $0x1], 0 }
  0x17   :  { %29 = vsyncpa [#allocation12], 0 }
  0x18   :  { %31 = vsyncpa [#allocation12 + $0x1], 0 }
  0x19   :  { %32 = vsyncpa [#allocation15], 0 }
  0x1a   :  { %33 = vsyncpa [#allocation18], 0 }
  0x1b   :  { %34 = vsyncpa [#allocation21], 0 }
  0x1c   :  { %35 = vsyncpa [#allocation24], 0 }
  0x1d   :  { %36 = vsyncpa [#allocation4], 0 }
  0x1e   :  { %38 = vsyncpa [#allocation4 + $0x1], 0  ;;  %s3415_s18 = smov 0   ;;  %s3417_s19 = smov 0  }
  0x1f   :  { %s3419_s20 = smov 0   ;;  %s3421_s21 = smov 0  }
  0x20   :  { %s3423_s22 = smov 0   ;;  %s3425_s23 = smov 0  }
  0x21 LB: > { %4240 = sst [smem:[#allocation37_spill]] %s3290_s18  ;;  %s3446_s24 = sadd.s32 4294967295, %s3310_s23   ;;  %s3310_s23 = sphi %s3425_s23, %s44_s23   ;;  %s3306_s22 = sphi %s3423_s22, %s4310_s22   ;;  %s3302_s21 = sphi %s3421_s21, %s4309_s21   ;;  %s3298_s20 = sphi %s3419_s20, %s4305_s20   ;;  %s3294_s19 = sphi %s3417_s19, %s4308_s19   ;;  %s3290_s18 = sphi %s3415_s18, %s4307_s18  }
  0x22   : > { %4241 = sst [smem:[#allocation38_spill]] %s3298_s20  ;;  %p2171_p0 = scmp.ge.s32.totalorder %s3310_s23, 1 }
  0x23   : > { %4242 = sst [smem:[#allocation39_spill]] %s3302_s21  ;;  %p4200_p1 = scmp.eq.s32.totalorder %s3446_s24, 0 }
  0x24   : > { %4243 = sst [smem:[#allocation40_spill]] %s3310_s23  ;;  %p440_p2 = scmp.lt.s32.totalorder %s3310_s23, 3 }
  0x25   : > { %s3312_s26 = smov [#allocation13]   ;;  %s3313_s29 = smov [#allocation14]  }
  0x26   : > { %p3451_p3 = pnand %p2171_p0, %p440_p2  ;;  %s452_s27 = sshll.u32 %s3312_s26, 4  ;;  %s3455_s27 = int_to_ptr.vmem [resolvable:$true] %s452_s27 }
  0x27   : > { %s465_s30 = sshll.u32 %s3313_s29, 4  ;;  %s3314_s16 = smov [#allocation17]   ;;  %s3466_s30 = int_to_ptr.vmem [resolvable:$true] %s465_s30 }
  0x28   : > { %s4244_s25 = scalar_select %p3451_p3, 1, 0 }
  0x29   : > { %p2613_p4 = pneg %p3451_p3  ;;  %s3468_s17 = sshll.u32 %s3314_s16, 4  ;;  %s492_s17 = int_to_ptr.vmem [resolvable:$true] %s3468_s17 }
  0x2a   : > { %4245 = sst [smem:[#allocation41_spill]] %s4244_s25 }
  0x2b   : > { %p3462_p6 = pnand %p2613_p4, %p4200_p1  ;;  %s4247_s6 = sld [smem:[#allocation51_spill]] }
  0x2d   : > { %s4246_s28 = scalar_select %p3462_p6, 1, 0 }
  0x2e   : > { %p3478_p8 = pneg %p3462_p6 }
  0x30   : > { %s4248_s4 = scalar_select %p3478_p8, 1, 0 }
  0x31   : > { %s2764_s21 = scalar_lea.hbm %s4247_s6, 512 }
  0x32   : > { %p2765_p7 = scmp.ne.s32.totalorder %s4247_s6, %s2764_s21  ;;  %p2771_p11 = scmp.lt.u32.totalorder %s2764_s21, %s4247_s6 }
  0x34   : > { %p2767_p9 = pnand %p3478_p8, %p2765_p7 }
  0x36   : > { %p2768_p10 = pneg %p2767_p9 }
  0x38   : > { %p2773_p12 = pnand %p2771_p11, %p2768_p10 }
  0x3a   : > { %2776 = shalt.err (!%p2773_p12)
}
  0x3b   : > { %s2777_s5 = scalar_lea.vmem %s3455_s27, 512  ;;  %p2785_p4 = scmp.lt.s32.totalorder %s3455_s27, %s3455_s27 }
  0x3c   : > { %p2778_p13 = scmp.ne.s32.totalorder %s3455_s27, %s2777_s5  ;;  %p2786_p5 = scmp.lt.s32.totalorder %s2777_s5, %s2777_s5 }
  0x3e   : > { %p2780_p0 = pnand %p2778_p13, %p3478_p8  ;;  %p2787_p7 = por %p2786_p5, %p2785_p4 }
  0x40   : > { %p2781_p2 = pneg %p2780_p0 }
  0x42   : > { %p2788_p9 = pnand %p2787_p7, %p2781_p2 }
  0x44   : > { %2791 = shalt.err (!%p2788_p9)
}
  0x45   : > { %s4202_s15 = smov 128   ;;  %s4204_s21 = smov 8  }
  0x46   : > { %2616 = dma.hbm_to_vmem [thread:$0]  (!%p3462_p6), %s4247_s6, 512, %s3455_s27, [#allocation12], %s4202_s15, %s4202_s15, %s4204_s21  }
  0x47   : > { %s4249_s7 = sld [smem:[#allocation52_spill]] }
  0x4d   : > { %s2792_s5 = scalar_lea.hbm %s4249_s7, 512 }
  0x4e   : > { %p2793_p5 = scmp.ne.s32.totalorder %s4249_s7, %s2792_s5  ;;  %p2799_p12 = scmp.lt.u32.totalorder %s2792_s5, %s4249_s7 }
  0x50   : > { %p2795_p10 = pnand %p2793_p5, %p3478_p8 }
  0x52   : > { %p2796_p11 = pneg %p2795_p10 }
  0x54   : > { %p2801_p13 = pnand %p2799_p12, %p2796_p11 }
  0x56   : > { %2804 = shalt.err (!%p2801_p13)
}
  0x57   : > { %s2805_s27 = scalar_lea.vmem %s3466_s30, 512  ;;  %p2813_p7 = scmp.lt.s32.totalorder %s3466_s30, %s3466_s30 }
  0x58   : > { %p2806_p0 = scmp.ne.s32.totalorder %s3466_s30, %s2805_s27  ;;  %p2814_p9 = scmp.lt.s32.totalorder %s2805_s27, %s2805_s27 }
  0x5a   : > { %p2808_p2 = pnand %p2806_p0, %p3478_p8  ;;  %p2815_p5 = por %p2814_p9, %p2813_p7 }
  0x5c   : > { %p2809_p4 = pneg %p2808_p2 }
  0x5e   : > { %p2816_p10 = pnand %p2815_p5, %p2809_p4 }
  0x60   : > { %2819 = shalt.err (!%p2816_p10)
}
  0x61   : > { %2619 = dma.hbm_to_vmem [thread:$0]  (!%p3462_p6), %s4249_s7, 512, %s3466_s30, [#allocation15], %s4202_s15, %s4202_s15, %s4204_s21  }
  0x62   : > { %s4250_s9 = sld [smem:[#allocation54_spill]] }
  0x68   : > { %s2820_s25 = scalar_lea.hbm %s4250_s9, 512 }
  0x69   : > { %p2821_p11 = scmp.ne.s32.totalorder %s4250_s9, %s2820_s25  ;;  %p2827_p0 = scmp.lt.u32.totalorder %s2820_s25, %s4250_s9 }
  0x6b   : > { %p2823_p12 = pnand %p2821_p11, %p3478_p8 }
  0x6d   : > { %p2824_p13 = pneg %p2823_p12 }
  0x6f   : > { %p2829_p2 = pnand %p2827_p0, %p2824_p13 }
  0x71   : > { %2832 = shalt.err (!%p2829_p2)
}
  0x72   : > { %s2833_s27 = scalar_lea.vmem %s492_s17, 512  ;;  %p2841_p5 = scmp.lt.s32.totalorder %s492_s17, %s492_s17 }
  0x73   : > { %p2834_p4 = scmp.ne.s32.totalorder %s492_s17, %s2833_s27  ;;  %p2842_p10 = scmp.lt.s32.totalorder %s2833_s27, %s2833_s27 }
  0x75   : > { %p2836_p7 = pnand %p2834_p4, %p3478_p8  ;;  %p2843_p1 = por %p2842_p10, %p2841_p5 }
  0x77   : > { %p2837_p9 = pneg %p2836_p7 }
  0x79   : > { %p2844_p3 = pnand %p2843_p1, %p2837_p9 }
  0x7b   : > { %2847 = shalt.err (!%p2844_p3)
}
  0x7c   : > { %2625 = dma.hbm_to_vmem [thread:$0]  (!%p3462_p6), %s4250_s9, 512, %s492_s17, [#allocation18], %s4202_s15, %s4202_s15, %s4204_s21  }
  0x7d   : > { %s3317_s2 = smov [#allocation20]   ;;  %s3318_s14 = smov [#allocation23]  }
  0x7e   : > { %s517_s12 = sshll.u32 %s3317_s2, 4  ;;  %s543_s25 = sshll.u32 %s3318_s14, 4  ;;  %s518_s12 = int_to_ptr.vmem [resolvable:$true] %s517_s12  ;;  %s544_s25 = int_to_ptr.vmem [resolvable:$true] %s543_s25 }
  0x7f   : > { %s4251_s11 = sld [smem:[#allocation56_spill]] }
  0x85   : > { %s2848_s16 = scalar_lea.hbm %s4251_s11, 512 }
  0x86   : > { %p2849_p1 = scmp.ne.s32.totalorder %s4251_s11, %s2848_s16  ;;  %p2855_p12 = scmp.lt.u32.totalorder %s2848_s16, %s4251_s11 }
  0x88   : > { %p2851_p3 = pnand %p2849_p1, %p3478_p8 }
  0x8a   : > { %p2852_p11 = pneg %p2851_p3 }
  0x8c   : > { %p2857_p13 = pnand %p2855_p12, %p2852_p11 }
  0x8e   : > { %2860 = shalt.err (!%p2857_p13)
}
  0x8f   : > { %s2861_s17 = scalar_lea.vmem %s518_s12, 512  ;;  %p2869_p7 = scmp.lt.s32.totalorder %s518_s12, %s518_s12 }
  0x90   : > { %p2862_p0 = scmp.ne.s32.totalorder %s518_s12, %s2861_s17  ;;  %p2870_p9 = scmp.lt.s32.totalorder %s2861_s17, %s2861_s17 }
  0x92   : > { %p2864_p2 = pnand %p2862_p0, %p3478_p8  ;;  %p2871_p5 = por %p2870_p9, %p2869_p7 }
  0x94   : > { %p2865_p4 = pneg %p2864_p2 }
  0x96   : > { %p2872_p10 = pnand %p2871_p5, %p2865_p4 }
  0x98   : > { %2875 = shalt.err (!%p2872_p10)
}
  0x99   : > { %2631 = dma.hbm_to_vmem [thread:$0]  (!%p3462_p6), %s4251_s11, 512, %s518_s12, [#allocation21], %s4202_s15, %s4202_s15, %s4204_s21  }
  0x9a   : > { %s4252_s13 = sld [smem:[#allocation58_spill]] }
  0xa0   : > { %s2876_s26 = scalar_lea.hbm %s4252_s13, 512 }
  0xa1   : > { %p2877_p1 = scmp.ne.s32.totalorder %s4252_s13, %s2876_s26  ;;  %p2883_p12 = scmp.lt.u32.totalorder %s2876_s26, %s4252_s13 }
  0xa3   : > { %p2879_p3 = pnand %p2877_p1, %p3478_p8 }
  0xa5   : > { %p2880_p11 = pneg %p2879_p3 }
  0xa7   : > { %p2885_p13 = pnand %p2883_p12, %p2880_p11 }
  0xa9   : > { %2888 = shalt.err (!%p2885_p13)
}
  0xaa   : > { %s2889_s30 = scalar_lea.vmem %s544_s25, 512  ;;  %p2897_p7 = scmp.lt.s32.totalorder %s544_s25, %s544_s25 }
  0xab   : > { %p2890_p0 = scmp.ne.s32.totalorder %s544_s25, %s2889_s30  ;;  %p2898_p9 = scmp.lt.s32.totalorder %s2889_s30, %s2889_s30 }
  0xad   : > { %p2892_p2 = pnand %p2890_p0, %p3478_p8  ;;  %p2899_p5 = por %p2898_p9, %p2897_p7 }
  0xaf   : > { %p2893_p4 = pneg %p2892_p2 }
  0xb1   : > { %p2900_p10 = pnand %p2899_p5, %p2893_p4 }
  0xb3   : > { %2903 = shalt.err (!%p2900_p10)
}
  0xb4   : > { %2637 = dma.hbm_to_vmem [thread:$0]  (!%p3462_p6), %s4252_s13, 512, %s544_s25, [#allocation24], %s4202_s15, %s4202_s15, %s4204_s21  }
  0xb5   : > { %s2170_s6 = sadd.s32 4294967294, %s3310_s23   ;;  %s56_s0 = sadd.s32 1, %s3306_s22 }
  0xb6   : > { %s65_s2 = sadd.s32 1, %s3298_s20  ;;  %p58_p1 = scmp.ge.s32.totalorder %s56_s0, 2 }
  0xb7   : > { %p72_p3 = scmp.ne.s32.totalorder %s3298_s20, %s3294_s19  ;;  %p73_p11 = scmp.eq.s32.totalorder %s3310_s23, 0 }
  0xb8   : > { %p78_p12 = scmp.ne.s32.totalorder %s3294_s19, %s3290_s18  ;;  %s4312_s0 = smov (%p58_p1, %s56_s0), 0 }
  0xb9   : > { %4253 = sst [smem:[#allocation42_spill]] %s4312_s0  ;;  %p74_p13 = por %p73_p11, %p72_p3 }
  0xba   : > { %p4254_p0 = scmp.eq.s32.totalorder %s3446_s24, 0  ;;  %s60_s25 = ssub.s32 %s3306_s22, %s4312_s0 }
  0xbb   : > { %p427_p4 = scmp.eq.s32.totalorder %s3446_s24, 1  ;;  %p63_p7 = scmp.eq.s32.totalorder %s60_s25, 0 }
  0xbc   : > { %p3604_p2 = por %p4254_p0, %p78_p12  ;;  %p433_p9 = scmp.eq.s32.totalorder %s2170_s6, 1 }
  0xbd   : > { %p3611_p5 = por %p427_p4, %p72_p3  ;;  %p2673_p10 = scmp.lt.s32.totalorder %s3310_s23, 2 }
  0xbe   : > { %s4255_s14 = scalar_select %p3604_p2, 1, 0 }
  0xbf   : > { %s4256_s26 = scalar_select %p3611_p5, 1, 0 }
  0xc0   : > { %s3617_s29 = scalar_select %p63_p7, %s3298_s20, %s65_s2  }
  0xc1   : > { %p3619_p1 = por %p433_p9, %p78_p12  ;;  %s3624_s5 = sand.u32 1, %s3298_s20  }
  0xc2   : > { %4257 = sst [smem:[#allocation43_spill]] %s3617_s29  ;;  %p3626_p11 = pnand %p2673_p10, %p74_p13 }
  0xc3   : > { %s4258_s16 = scalar_select %p3619_p1, 1, 0 }
  0xc4   : > { %s4260_s27 = scalar_select %p3626_p11, 1, 0 }
  0xc5   : > { %4259 = sst [smem:[#allocation44_spill]] %s4258_s16  ;;  %s3631_s30 = sand.u32 1, %s3310_s23  }
  0xc6   : > { %s2185_s12 = sshll.u32 %s3306_s22, 4  ;;  %s4261_s1 = sld [smem:[#allocation46_spill]] }
  0xc7   : > { %s596_s25 = scalar_lea.vmem [#allocation5], %s3624_s5  ;;  %p3647_p12 = pneg %p3626_p11 }
  0xc8   : > { %s604_s15 = sshll.u32 %s596_s25, 4  ;;  %s3640_s15 = int_to_ptr.vmem [resolvable:$true] %s604_s15 }
  0xc9   : > { %s4262_s9 = scalar_select %p3647_p12, 1, 0 }
  0xcc   : > { %s3637_s2 = scalar_lea.hbm %s4261_s1, %s2185_s12  ;;  %s2909_s6 = scalar_lea.hbm %s4261_s1, 32 }
  0xcd   : > { %s2904_s7 = scalar_lea.hbm %s3637_s2, 16  ;;  %p2910_p4 = scmp.lt.u32.totalorder %s3637_s2, %s4261_s1 }
  0xce   : > { %p2905_p3 = scmp.ne.s32.totalorder %s3637_s2, %s2904_s7  ;;  %p2911_p7 = scmp.lt.u32.totalorder %s2909_s6, %s2904_s7 }
  0xcf   : > { %p2913_p10 = scmp.lt.u32.totalorder %s2904_s7, %s3637_s2 }
  0xd0   : > { %p2907_p13 = pnand %p3647_p12, %p2905_p3  ;;  %p2912_p9 = por %p2911_p7, %p2910_p4 }
  0xd2   : > { %p2908_p0 = pneg %p2907_p13  ;;  %p2914_p1 = por %p2913_p10, %p2912_p9 }
  0xd4   : > { %p2915_p5 = pnand %p2914_p1, %p2908_p0 }
  0xd6   : > { %2918 = shalt.err (!%p2915_p5)
}
  0xd7   : > { %s2919_s21 = scalar_lea.vmem %s3640_s15, 16  ;;  %s3319_s12 = smov [#allocation5]  }
  0xd8   : > { %p2920_p3 = scmp.ne.s32.totalorder %s3640_s15, %s2919_s21  ;;  %s2924_s17 = sshll.u32 %s3319_s12, 4  ;;  %s2925_s17 = int_to_ptr.vmem [resolvable:$false] %s2924_s17 }
  0xd9   : > { %s2926_s11 = scalar_lea.vmem %s2925_s17, 32  ;;  %p2927_p6 = scmp.lt.s32.totalorder %s3640_s15, %s2925_s17 }
  0xda   : > { %p2922_p13 = pnand %p2920_p3, %p3647_p12  ;;  %p2928_p8 = scmp.lt.s32.totalorder %s2926_s11, %s2919_s21 }
  0xdc   : > { %p2923_p2 = pneg %p2922_p13  ;;  %p2929_p4 = por %p2928_p8, %p2927_p6 }
  0xde   : > { %p2930_p7 = pnand %p2929_p4, %p2923_p2 }
  0xe0   : > { %2933 = shalt.err (!%p2930_p7)
}
  0xe1   : > { %s4263_s7 = scalar_lea.sflag [#allocation6], %s3631_s30  ;;  %s3673_s6 = sshll.u32 %s3624_s5, 4 }
  0xe2   : > { %2647 = dma.hbm_to_vmem [thread:$0]  (!%p3626_p11), %s3637_s2, 16, %s3640_s15, %s4263_s7  }
  0xe3   : > { %s3676_s25 = sshll.u32 %s3306_s22, 8  ;;  %s4264_s3 = sld [smem:[#allocation48_spill]] }
  0xe4   : > { %s636_s11 = scalar_lea.vmem [#allocation8], %s3673_s6  ;;  %s4222_s15 = scalar_lea.sflag [#allocation9], %s3631_s30 }
  0xe5   : > { %s643_s1 = sshll.u32 %s636_s11, 4  ;;  %s3685_s1 = int_to_ptr.vmem [resolvable:$true] %s643_s1 }
  0xe9   : > { %s3682_s17 = scalar_lea.hbm %s4264_s3, %s3676_s25  ;;  %s2939_s21 = scalar_lea.hbm %s4264_s3, 512 }
  0xea   : > { %s2934_s2 = scalar_lea.hbm %s3682_s17, 256  ;;  %p2940_p5 = scmp.lt.u32.totalorder %s3682_s17, %s4264_s3 }
  0xeb   : > { %p2935_p6 = scmp.ne.s32.totalorder %s3682_s17, %s2934_s2  ;;  %p2941_p1 = scmp.lt.u32.totalorder %s2939_s21, %s2934_s2 }
  0xec   : > { %p2943_p9 = scmp.lt.u32.totalorder %s2934_s2, %s3682_s17 }
  0xed   : > { %p2937_p8 = pnand %p2935_p6, %p3647_p12  ;;  %p2942_p0 = por %p2941_p1, %p2940_p5 }
  0xef   : > { %p2938_p2 = pneg %p2937_p8  ;;  %p2944_p10 = por %p2943_p9, %p2942_p0 }
  0xf1   : > { %p2945_p3 = pnand %p2944_p10, %p2938_p2 }
  0xf3   : > { %2948 = shalt.err (!%p2945_p3)
}
  0xf4   : > { %s2949_s11 = scalar_lea.vmem %s3685_s1, 256  ;;  %s3320_s13 = smov [#allocation8]  }
  0xf5   : > { %p2950_p13 = scmp.ne.s32.totalorder %s3685_s1, %s2949_s11  ;;  %s2954_s7 = sshll.u32 %s3320_s13, 4  ;;  %s2955_s7 = int_to_ptr.vmem [resolvable:$false] %s2954_s7 }
  0xf6   : > { %s2956_s0 = scalar_lea.vmem %s2955_s7, 512  ;;  %p2957_p6 = scmp.lt.s32.totalorder %s3685_s1, %s2955_s7 }
  0xf7   : > { %p2952_p4 = pnand %p2950_p13, %p3647_p12  ;;  %p2958_p8 = scmp.lt.s32.totalorder %s2956_s0, %s2949_s11 }
  0xf9   : > { %p2953_p7 = pneg %p2952_p4  ;;  %p2959_p5 = por %p2958_p8, %p2957_p6 }
  0xfb   : > { %p2960_p1 = pnand %p2959_p5, %p2953_p7 }
  0xfd   : > { %2963 = shalt.err (!%p2960_p1)
}
  0xfe   : > { %s4265_s2 = smov 8   ;;  %s4266_s21 = smov 128  }
  0xff   : > { %2653 = dma.hbm_to_vmem [thread:$0]  (!%p3626_p11), %s3682_s17, 256, %s3685_s1, %s4222_s15, %s4266_s21, %s4266_s21, %s4265_s2  }
 0x100   : > { %s3321_s12 = smov [#allocation16]   ;;  %s3322_s3 = smov [#allocation19]  }
 0x101   : > { %s478_s13 = sshll.u32 %s3321_s12, 4  ;;  %s504_s7 = sshll.u32 %s3322_s3, 4  ;;  %s479_s13 = int_to_ptr.vmem [resolvable:$true] %s478_s13  ;;  %s505_s7 = int_to_ptr.vmem [resolvable:$true] %s504_s7 }
 0x102   : > { %s4267_s8 = sld [smem:[#allocation53_spill]]  ;;  %p4268_p0 = scmp.ne.s32.totalorder %s4248_s4, 0 }
 0x108   : > { %s2964_s29 = scalar_lea.hbm %s4267_s8, 512 }
 0x109   : > { %p2965_p2 = scmp.ne.s32.totalorder %s4267_s8, %s2964_s29  ;;  %p2971_p3 = scmp.lt.u32.totalorder %s2964_s29, %s4267_s8 }
 0x10b   : > { %p2967_p9 = pnand %p2965_p2, %p4268_p0 }
 0x10d   : > { %p2968_p10 = pneg %p2967_p9 }
 0x10f   : > { %p2973_p13 = pnand %p2971_p3, %p2968_p10 }
 0x111   : > { %2976 = shalt.err (!%p2973_p13)
}
 0x112   : > { %s2977_s1 = scalar_lea.vmem %s479_s13, 512  ;;  %p2985_p8 = scmp.lt.s32.totalorder %s479_s13, %s479_s13 }
 0x113   : > { %p2978_p4 = scmp.ne.s32.totalorder %s479_s13, %s2977_s1  ;;  %p2986_p5 = scmp.lt.s32.totalorder %s2977_s1, %s2977_s1 }
 0x115   : > { %p2980_p7 = pnand %p2978_p4, %p4268_p0  ;;  %p2987_p1 = por %p2986_p5, %p2985_p8 }
 0x117   : > { %p2981_p6 = pneg %p2980_p7 }
 0x119   : > { %p2988_p11 = pnand %p2987_p1, %p2981_p6 }
 0x11b   : > { %2991 = shalt.err (!%p2988_p11)
}
 0x11c   : > { %p4269_p2 = scmp.ne.s32.totalorder %s4246_s28, 0  ;;  %s4270_s10 = sld [smem:[#allocation55_spill]] }
 0x11e   : > { %2622 = dma.hbm_to_vmem [thread:$0]  (!%p4269_p2), %s4267_s8, 512, %s479_s13, [#allocation15], %s4266_s21, %s4266_s21, %s4265_s2  }
 0x122   : > { %s2992_s29 = scalar_lea.hbm %s4270_s10, 512 }
 0x123   : > { %p2993_p9 = scmp.ne.s32.totalorder %s4270_s10, %s2992_s29  ;;  %p2999_p3 = scmp.lt.u32.totalorder %s2992_s29, %s4270_s10 }
 0x125   : > { %p2995_p11 = pnand %p2993_p9, %p4268_p0 }
 0x127   : > { %p2996_p10 = pneg %p2995_p11 }
 0x129   : > { %p3001_p13 = pnand %p2999_p3, %p2996_p10 }
 0x12b   : > { %3004 = shalt.err (!%p3001_p13)
}
 0x12c   : > { %s3005_s0 = scalar_lea.vmem %s505_s7, 512  ;;  %p3013_p8 = scmp.lt.s32.totalorder %s505_s7, %s505_s7 }
 0x12d   : > { %p3006_p4 = scmp.ne.s32.totalorder %s505_s7, %s3005_s0  ;;  %p3014_p5 = scmp.lt.s32.totalorder %s3005_s0, %s3005_s0 }
 0x12f   : > { %p3008_p7 = pnand %p3006_p4, %p4268_p0  ;;  %p3015_p1 = por %p3014_p5, %p3013_p8 }
 0x131   : > { %p3009_p6 = pneg %p3008_p7 }
 0x133   : > { %p3016_p12 = pnand %p3015_p1, %p3009_p6 }
 0x135   : > { %3019 = shalt.err (!%p3016_p12)
}
 0x136   : > { %2628 = dma.hbm_to_vmem [thread:$0]  (!%p4269_p2), %s4270_s10, 512, %s505_s7, [#allocation18], %s4266_s21, %s4266_s21, %s4265_s2  }
 0x137   : > { %s3323_s3 = smov [#allocation22]   ;;  %s3324_s20 = smov [#allocation25]  }
 0x138   : > { %s530_s18 = sshll.u32 %s3323_s3, 4  ;;  %s556_s23 = sshll.u32 %s3324_s20, 4  ;;  %s531_s18 = int_to_ptr.vmem [resolvable:$true] %s530_s18  ;;  %s557_s23 = int_to_ptr.vmem [resolvable:$true] %s556_s23 }
 0x139   : > { %s4271_s17 = sld [smem:[#allocation57_spill]] }
 0x13f   : > { %s3020_s12 = scalar_lea.hbm %s4271_s17, 512 }
 0x140   : > { %p3021_p12 = scmp.ne.s32.totalorder %s4271_s17, %s3020_s12  ;;  %p3027_p10 = scmp.lt.u32.totalorder %s3020_s12, %s4271_s17 }
 0x142   : > { %p3023_p9 = pnand %p3021_p12, %p4268_p0 }
 0x144   : > { %p3024_p11 = pneg %p3023_p9 }
 0x146   : > { %p3029_p3 = pnand %p3027_p10, %p3024_p11 }
 0x148   : > { %3032 = shalt.err (!%p3029_p3)
}
 0x149   : > { %s3033_s7 = scalar_lea.vmem %s531_s18, 512  ;;  %p3041_p6 = scmp.lt.s32.totalorder %s531_s18, %s531_s18 }
 0x14a   : > { %p3034_p13 = scmp.ne.s32.totalorder %s531_s18, %s3033_s7  ;;  %p3042_p8 = scmp.lt.s32.totalorder %s3033_s7, %s3033_s7 }
 0x14c   : > { %p3036_p4 = pnand %p3034_p13, %p4268_p0  ;;  %p3043_p5 = por %p3042_p8, %p3041_p6 }
 0x14e   : > { %p3037_p7 = pneg %p3036_p4 }
 0x150   : > { %p3044_p1 = pnand %p3043_p5, %p3037_p7 }
 0x152   : > { %3047 = shalt.err (!%p3044_p1)
}
 0x153   : > { %2634 = dma.hbm_to_vmem [thread:$0]  (!%p4269_p2), %s4271_s17, 512, %s531_s18, [#allocation21], %s4266_s21, %s4266_s21, %s4265_s2  }
 0x154   : > { %s4272_s29 = sld [smem:[#allocation59_spill]] }
 0x15a   : > { %s3048_s16 = scalar_lea.hbm %s4272_s29, 512 }
 0x15b   : > { %p3049_p12 = scmp.ne.s32.totalorder %s4272_s29, %s3048_s16  ;;  %p3055_p10 = scmp.lt.u32.totalorder %s3048_s16, %s4272_s29 }
 0x15d   : > { %p3051_p9 = pnand %p3049_p12, %p4268_p0 }
 0x15f   : > { %p3052_p11 = pneg %p3051_p9 }
 0x161   : > { %p3057_p3 = pnand %p3055_p10, %p3052_p11 }
 0x163   : > { %3060 = shalt.err (!%p3057_p3)
}
 0x164   : > { %s3061_s7 = scalar_lea.vmem %s557_s23, 512  ;;  %p3069_p6 = scmp.lt.s32.totalorder %s557_s23, %s557_s23 }
 0x165   : > { %p3062_p13 = scmp.ne.s32.totalorder %s557_s23, %s3061_s7  ;;  %p3070_p8 = scmp.lt.s32.totalorder %s3061_s7, %s3061_s7 }
 0x167   : > { %p3064_p4 = pnand %p3062_p13, %p4268_p0  ;;  %p3071_p5 = por %p3070_p8, %p3069_p6 }
 0x169   : > { %p3065_p7 = pneg %p3064_p4 }
 0x16b   : > { %p3072_p1 = pnand %p3071_p5, %p3065_p7 }
 0x16d   : > { %3075 = shalt.err (!%p3072_p1)
}
 0x16e   : > { %2640 = dma.hbm_to_vmem [thread:$0]  (!%p4269_p2), %s4272_s29, 512, %s557_s23, [#allocation24], %s4266_s21, %s4266_s21, %s4265_s2  }
 0x16f   : > { %s2182_s4 = sshll.u32 %s3624_s5, 5  ;;  %s2246_s1 = sshll.u32 %s3306_s22, 9 }
 0x170   : > { %s4273_s16 = sld [smem:[#allocation45_spill]]  ;;  %s574_s28 = scalar_lea.vmem [#allocation2], %s2182_s4 }
 0x171   : > { %s583_s11 = sshll.u32 %s574_s28, 4  ;;  %s4274_s7 = sld [smem:[#allocation47_spill]]  ;;  %s3805_s11 = int_to_ptr.vmem [resolvable:$true] %s583_s11 }
 0x172   : > { %s571_s23 = scalar_lea.sflag [#allocation3], %s3624_s5  ;;  %p4275_p2 = scmp.ne.s32.totalorder %s4262_s9, 0 }
 0x176   : > { %s3803_s12 = scalar_lea.hbm %s4273_s16, %s2246_s1  ;;  %s3081_s20 = scalar_lea.hbm %s4273_s16, 1024 }
 0x177   : > { %s3811_s18 = scalar_lea.hbm %s4274_s7, %s3676_s25  ;;  %s3076_s15 = scalar_lea.hbm %s3803_s12, 512 }
 0x178   : > { %p3077_p0 = scmp.ne.s32.totalorder %s3803_s12, %s3076_s15  ;;  %p3082_p11 = scmp.lt.u32.totalorder %s3803_s12, %s4273_s16 }
 0x179   : > { %p3083_p10 = scmp.lt.u32.totalorder %s3081_s20, %s3076_s15  ;;  %p3085_p13 = scmp.lt.u32.totalorder %s3076_s15, %s3803_s12 }
 0x17a   : > { %p3079_p12 = pnand %p3077_p0, %p4275_p2 }
 0x17b   : > { %p3084_p3 = por %p3083_p10, %p3082_p11 }
 0x17c   : > { %p3080_p9 = pneg %p3079_p12 }
 0x17d   : > { %p3086_p4 = por %p3085_p13, %p3084_p3 }
 0x17f   : > { %p3087_p7 = pnand %p3086_p4, %p3080_p9 }
 0x181   : > { %3090 = shalt.err (!%p3087_p7)
}
 0x182   : > { %s3091_s28 = scalar_lea.vmem %s3805_s11, 512  ;;  %s3325_s0 = smov [#allocation2]  }
 0x183   : > { %p3092_p6 = scmp.ne.s32.totalorder %s3805_s11, %s3091_s28  ;;  %s3096_s13 = sshll.u32 %s3325_s0, 4  ;;  %s3097_s13 = int_to_ptr.vmem [resolvable:$false] %s3096_s13 }
 0x184   : > { %s3098_s8 = scalar_lea.vmem %s3097_s13, 1024  ;;  %p3099_p1 = scmp.lt.s32.totalorder %s3805_s11, %s3097_s13 }
 0x185   : > { %p3094_p8 = pnand %p3092_p6, %p4275_p2  ;;  %p3100_p0 = scmp.lt.s32.totalorder %s3098_s8, %s3091_s28 }
 0x187   : > { %p3095_p5 = pneg %p3094_p8  ;;  %p3101_p12 = por %p3100_p0, %p3099_p1 }
 0x189   : > { %p3102_p11 = pnand %p3101_p12, %p3095_p5 }
 0x18b   : > { %3105 = shalt.err (!%p3102_p11)
}
 0x18c   : > { %p4276_p9 = scmp.ne.s32.totalorder %s4260_s27, 0  ;;  %s615_s15 = scalar_lea.vmem [#allocation7], %s3673_s6 }
 0x18d   : > { %s622_s1 = sshll.u32 %s615_s15, 4  ;;  %s4277_s4 = sld [smem:[#allocation49_spill]]  ;;  %s3841_s1 = int_to_ptr.vmem [resolvable:$true] %s622_s1 }
 0x18e   : > { %2644 = dma.hbm_to_vmem [thread:$0]  (!%p4276_p9), %s3803_s12, 512, %s3805_s11, %s571_s23, %s4266_s21, %s4266_s21, %s4265_s2  }
 0x18f   : > { %s3106_s0 = scalar_lea.hbm %s3811_s18, 256  ;;  %s3111_s10 = scalar_lea.hbm %s4274_s7, 512 }
 0x190   : > { %p3107_p10 = scmp.ne.s32.totalorder %s3811_s18, %s3106_s0  ;;  %p3112_p4 = scmp.lt.u32.totalorder %s3811_s18, %s4274_s7 }
 0x191   : > { %p3113_p7 = scmp.lt.u32.totalorder %s3111_s10, %s3106_s0  ;;  %p3115_p8 = scmp.lt.u32.totalorder %s3106_s0, %s3811_s18 }
 0x192   : > { %p3109_p3 = pnand %p3107_p10, %p4275_p2 }
 0x193   : > { %s3847_s28 = scalar_lea.hbm %s4277_s4, %s3676_s25  ;;  %p3114_p6 = por %p3113_p7, %p3112_p4 }
 0x194   : > { %p3110_p13 = pneg %p3109_p3 }
 0x195   : > { %p3116_p5 = por %p3115_p8, %p3114_p6 }
 0x197   : > { %p3117_p1 = pnand %p3116_p5, %p3110_p13 }
 0x199   : > { %3120 = shalt.err (!%p3117_p1)
}
 0x19a   : > { %s3121_s25 = scalar_lea.vmem %s3841_s1, 256  ;;  %s3326_s11 = smov [#allocation7]  }
 0x19b   : > { %p3122_p0 = scmp.ne.s32.totalorder %s3841_s1, %s3121_s25  ;;  %s3126_s23 = sshll.u32 %s3326_s11, 4  ;;  %s3127_s23 = int_to_ptr.vmem [resolvable:$false] %s3126_s23 }
 0x19c   : > { %s3128_s16 = scalar_lea.vmem %s3127_s23, 512  ;;  %p3129_p10 = scmp.lt.s32.totalorder %s3841_s1, %s3127_s23 }
 0x19d   : > { %p3124_p12 = pnand %p3122_p0, %p4275_p2  ;;  %p3130_p3 = scmp.lt.s32.totalorder %s3128_s16, %s3121_s25 }
 0x19f   : > { %p3125_p11 = pneg %p3124_p12  ;;  %p3131_p4 = por %p3130_p3, %p3129_p10 }
 0x1a1   : > { %p3132_p7 = pnand %p3131_p4, %p3125_p11 }
 0x1a3   : > { %3135 = shalt.err (!%p3132_p7)
}
 0x1a4   : > { %s4278_s10 = scalar_lea.sflag [#allocation6], %s3631_s30  ;;  %s657_s15 = scalar_lea.vmem [#allocation10], %s3673_s6 }
 0x1a5   : > { %2650 = dma.hbm_to_vmem [thread:$0]  (!%p4276_p9), %s3811_s18, 256, %s3841_s1, %s4278_s10, %s4266_s21, %s4266_s21, %s4265_s2  }
 0x1a6   : > { %s664_s3 = sshll.u32 %s657_s15, 4  ;;  %s3136_s20 = scalar_lea.hbm %s3847_s28, 256  ;;  %s3876_s3 = int_to_ptr.vmem [resolvable:$true] %s664_s3 }
 0x1a7   : > { %p3137_p13 = scmp.ne.s32.totalorder %s3847_s28, %s3136_s20  ;;  %s3141_s8 = scalar_lea.hbm %s4277_s4, 512 }
 0x1a8   : > { %p3142_p5 = scmp.lt.u32.totalorder %s3847_s28, %s4277_s4  ;;  %p3143_p1 = scmp.lt.u32.totalorder %s3141_s8, %s3136_s20 }
 0x1a9   : > { %p3139_p6 = pnand %p3137_p13, %p4275_p2  ;;  %p3145_p12 = scmp.lt.u32.totalorder %s3136_s20, %s3847_s28 }
 0x1aa   : > { %p3144_p0 = por %p3143_p1, %p3142_p5 }
 0x1ab   : > { %p3140_p8 = pneg %p3139_p6 }
 0x1ac   : > { %p3146_p11 = por %p3145_p12, %p3144_p0 }
 0x1ae   : > { %p3147_p10 = pnand %p3146_p11, %p3140_p8 }
 0x1b0   : > { %3150 = shalt.err (!%p3147_p10)
}
 0x1b1   : > { %s3151_s6 = scalar_lea.vmem %s3876_s3, 256  ;;  %s3327_s2 = smov [#allocation10]  }
 0x1b2   : > { %p3152_p3 = scmp.ne.s32.totalorder %s3876_s3, %s3151_s6  ;;  %s3156_s21 = sshll.u32 %s3327_s2, 4  ;;  %s3157_s21 = int_to_ptr.vmem [resolvable:$false] %s3156_s21 }
 0x1b3   : > { %s3158_s18 = scalar_lea.vmem %s3157_s21, 512  ;;  %p3159_p13 = scmp.lt.s32.totalorder %s3876_s3, %s3157_s21 }
 0x1b4   : > { %p3154_p4 = pnand %p3152_p3, %p4275_p2  ;;  %p3160_p6 = scmp.lt.s32.totalorder %s3158_s18, %s3151_s6 }
 0x1b6   : > { %p3155_p7 = pneg %p3154_p4  ;;  %p3161_p5 = por %p3160_p6, %p3159_p13 }
 0x1b8   : > { %p3162_p1 = pnand %p3161_p5, %p3155_p7 }
 0x1ba   : > { %3165 = shalt.err (!%p3162_p1)
}
 0x1bb   : > { %s3328_s1 = smov 64   ;;  %s3329_s11 = smov 4  }
 0x1bc   : > { %s4279_s23 = scalar_lea.sflag [#allocation9], %s3631_s30  ;;  %s2195_s16 = sshll.u32 %s3624_s5, 6 }
 0x1bd   : > { %2656 = dma.hbm_to_vmem [thread:$0]  (!%p4276_p9), %s3847_s28, 256, %s3876_s3, %s4279_s23, %s3328_s1, %s3328_s1, %s3329_s11  }
 0x1be   : > { %s2250_s10 = sshll.u32 %s3306_s22, 10  ;;  %s4280_s0 = sld [smem:[#allocation50_spill]] }
 0x1bf   : > { %s678_s8 = scalar_lea.vmem [#allocation11], %s2195_s16  ;;  %s675_s25 = scalar_lea.sflag [#allocation12], %s3631_s30 }
 0x1c0   : > { %s686_s12 = sshll.u32 %s678_s8, 4  ;;  %s3911_s12 = int_to_ptr.vmem [resolvable:$true] %s686_s12 }
 0x1c4   : > { %s3909_s13 = scalar_lea.hbm %s4280_s0, %s2250_s10  ;;  %s3171_s3 = scalar_lea.hbm %s4280_s0, 2048 }
 0x1c5   : > { %s3166_s6 = scalar_lea.hbm %s3909_s13, 1024  ;;  %p3172_p11 = scmp.lt.u32.totalorder %s3909_s13, %s4280_s0 }
 0x1c6   : > { %p3167_p8 = scmp.ne.s32.totalorder %s3909_s13, %s3166_s6  ;;  %p3173_p10 = scmp.lt.u32.totalorder %s3171_s3, %s3166_s6 }
 0x1c7   : > { %p3175_p4 = scmp.lt.u32.totalorder %s3166_s6, %s3909_s13 }
 0x1c8   : > { %p3169_p0 = pnand %p3167_p8, %p4275_p2  ;;  %p3174_p3 = por %p3173_p10, %p3172_p11 }
 0x1ca   : > { %p3170_p12 = pneg %p3169_p0  ;;  %p3176_p7 = por %p3175_p4, %p3174_p3 }
 0x1cc   : > { %p3177_p13 = pnand %p3176_p7, %p3170_p12 }
 0x1ce   : > { %3180 = shalt.err (!%p3177_p13)
}
 0x1cf   : > { %s3181_s18 = scalar_lea.vmem %s3911_s12, 1024  ;;  %s3330_s23 = smov [#allocation11]  }
 0x1d0   : > { %p3182_p6 = scmp.ne.s32.totalorder %s3911_s12, %s3181_s18  ;;  %s3186_s16 = sshll.u32 %s3330_s23, 4  ;;  %s3187_s16 = int_to_ptr.vmem [resolvable:$false] %s3186_s16 }
 0x1d1   : > { %s3188_s10 = scalar_lea.vmem %s3187_s16, 2048  ;;  %p3189_p8 = scmp.lt.s32.totalorder %s3911_s12, %s3187_s16 }
 0x1d2   : > { %p3184_p5 = pnand %p3182_p6, %p4275_p2  ;;  %p3190_p0 = scmp.lt.s32.totalorder %s3188_s10, %s3181_s18 }
 0x1d4   : > { %p3185_p1 = pneg %p3184_p5  ;;  %p3191_p11 = por %p3190_p0, %p3189_p8 }
 0x1d6   : > { %p3192_p10 = pnand %p3191_p11, %p3185_p1 }
 0x1d8   : > { %3195 = shalt.err (!%p3192_p10)
}
 0x1d9   : > { %2659 = dma.hbm_to_vmem [thread:$0]  (!%p4276_p9), %s3909_s13, 1024, %s3911_s12, %s675_s25, %s3328_s1, %s3328_s1, %s3329_s11  }
 0x1da   : > { %s4281_s9 = sld [smem:[#allocation41_spill]] }
 0x1e0   : > { %p4282_p2 = scmp.ne.s32.totalorder %s4281_s9, 0 }
 0x1e1   : > { %s3943_s15 = sand.u32 (!%p4282_p2), 1, %s3294_s19   ;;  %p4283_p12 = scmp.ne.s32.totalorder (!%p4282_p2), %s4255_s14, 0 }
 0x1e2   : > { %698 = sbr.rel (%p4282_p2) target bundleno = 1673 (0x689), region = 80  ;;  %s2199_s20 = sshll.u32 (!%p4282_p2), %s3943_s15, 5 }
 0x1e3   : > { %s701_s27 = scalar_lea.sflag (!%p4282_p2), [#allocation3], %s3943_s15  ;;  %s3949_s8 = scalar_lea.vmem (!%p4282_p2), [#allocation2], %s2199_s20 }
 0x1e9   : > { %3249 = dma.done.wait (%p4283_p12), %s701_s27, 512  }
 0x1ea   : > { %3251 = vsyncadd (%p4283_p12), %s701_s27, 4294966784  ;;  %s709_s30 = sand.u32 1, %s3446_s24   ;;  %s712_s11 = scalar_lea.vmem [#allocation5], %s3943_s15 }
 0x1eb   : > { %s710_s1 = scalar_lea.sflag [#allocation6], %s709_s30 }
 0x1ec   : > { %3253 = dma.done.wait (%p4283_p12), %s710_s1, 272  }
 0x1ed   : > { %3255 = vsyncadd (%p4283_p12), %s710_s1, 4294967024  ;;  %s3962_s13 = sshll.u32 %s3943_s15, 4  ;;  %s727_s25 = scalar_lea.sflag [#allocation9], %s709_s30 }
 0x1ee   : > { %s721_s12 = scalar_lea.vmem [#allocation7], %s3962_s13  ;;  %s730_s6 = scalar_lea.vmem [#allocation8], %s3962_s13 }
 0x1ef   : > { %3257 = dma.done.wait (%p4283_p12), %s727_s25, 512  }
 0x1f0   : > { %3259 = vsyncadd (%p4283_p12), %s727_s25, 4294966784  ;;  %s2203_s5 = sshll.u32 %s3943_s15, 6  ;;  %s739_s28 = scalar_lea.vmem [#allocation10], %s3962_s13 }
 0x1f1   : > { %s745_s3 = scalar_lea.sflag [#allocation12], %s709_s30  ;;  %s3972_s2 = scalar_lea.vmem [#allocation11], %s2203_s5 }
 0x1f2   : > { %3261 = dma.done.wait (%p4283_p12), %s745_s3, 1024  }
 0x1f3   : > { %3263 = vsyncadd (%p4283_p12), %s745_s3, 4294966272  ;;  %p4284_p9 = scmp.eq.s32.totalorder %s3446_s24, 0 }
 0x1f5   : > { %3265 = dma.done.wait (%p4284_p9), [#allocation12], 512   ;;  %p4285_p3 = pmov %p4284_p9 }
 0x1f7   : > { %3267 = vsyncadd (%p4285_p3), [#allocation12], 4294966784  ;;  %p4286_p4 = pmov %p4285_p3 }
 0x1f8   : > { %p4287_p7 = pmov %p4285_p3 }
 0x1f9   : > { %3269 = dma.done.wait (%p4286_p4), [#allocation15], 1024  }
 0x1fa   : > { %3271 = vsyncadd (%p4287_p7), [#allocation15], 4294966272  ;;  %p4288_p13 = pmov %p4285_p3 }
 0x1fb   : > { %p4289_p6 = pmov %p4285_p3 }
 0x1fc   : > { %3273 = dma.done.wait (%p4288_p13), [#allocation18], 1024  }
 0x1fd   : > { %3275 = vsyncadd (%p4289_p6), [#allocation18], 4294966272  ;;  %p4290_p5 = pmov %p4285_p3 }
 0x1fe   : > { %p4291_p1 = pmov %p4285_p3 }
 0x1ff   : > { %3277 = dma.done.wait (%p4290_p5), [#allocation21], 1024  }
 0x200   : > { %3279 = vsyncadd (%p4291_p1), [#allocation21], 4294966272  ;;  %p4292_p8 = pmov %p4291_p1 }
 0x201   : > { %p4293_p0 = pmov %p4291_p1 }
 0x202   : > { %3281 = dma.done.wait (%p4292_p8), [#allocation24], 1024  }
 0x203   : > { %3283 = vsyncadd (%p4293_p0), [#allocation24], 4294966272  ;;  %v3331_v0 = vmov 0   ;;  %vm862_vm0 = vcmask 23552   ;;  %v856_v2 = vld [vmem:[%s3949_s8] sm:$0xff]  ;;  %v857_v3 = vld [vmem:[%s3949_s8 + $0x8] sm:$0xff]  ;;  %v983_v1 = vlaneseq }
 0x204   : > { %2748 = vset.pattern.permute.xlu0 %v3331_v0  ;;  %2749 = vset.pattern.permute.xlu1 %v3331_v0  ;;  %vm4000_vm1 = vmpackc.low %vm862_vm0, %vm862_vm0  ;;  %v858_v4 = vld [vmem:[%s3949_s8 + $0x10] sm:$0xff]  ;;  %v2479_v5 = vpack.c.bf16 %v857_v3, %v856_v2  ;;  %v859_v6 = vld [vmem:[%s3949_s8 + $0x18] sm:$0xff]  ;;  %vm986_vm2 = vcmask 261120   ;;  %s4296_s24 = sld [smem:[#allocation39_spill]]  ;;  %s854_s14 = scalar_lea.vmem [#allocation26], %s2199_s20 }
 0x205   : > { %v860_v7 = vld [vmem:[%s721_s12] sm:$0xff]  ;;  %v2485_v8 = vpack.c.bf16 %v859_v6, %v858_v4  ;;  %v1136_v11 = vld [vmem:[#allocation14 + $0x8] sm:$0xff]  ;;  %v1138_v12 = vld [vmem:[#allocation14 + $0x18] sm:$0xff]  ;;  %s1889_s21 = sshll.u32 %s854_s14, 4  ;;  %s4297_s10 = sld [smem:[#allocation60_spill]]  ;;  %s4119_s21 = int_to_ptr.vmem [resolvable:$true] %s1889_s21 }
 0x206   : > { %2372 = vmatprep.mubr.msk.f32.mxu0 %vm862_vm0, %v860_v7  ;;  %2481 = vmatprep.subr.msk.bf16.mxu0 %vm4000_vm1, %v2479_v5  ;;  %v1135_v9 = vld [vmem:[#allocation14] sm:$0xff]  ;;  %v1137_v10 = vld [vmem:[#allocation14 + $0x10] sm:$0xff]  ;;  %v1265_v15 = vld [vmem:[#allocation17 + $0x8] sm:$0xff]  ;;  %s1875_s20 = scalar_lea.sflag [#allocation4], %s3943_s15  ;;  %s3196_s27 = scalar_lea.vmem %s4119_s21, 512 }
 0x207   : > { %2484 = vmatpush3.bf16.xpose.msk.msra.mxu0 %vm4000_vm1, %v2479_v5  ;;  %1141 = vperm.xlu0 %2748, %v1135_v9   ;;  %v2253_v13 = vld [vmem:[%s739_s28] sm:$0xff]   ;;  %v1267_v17 = vld [vmem:[#allocation17 + $0x18] sm:$0xff]  ;;  %v1710_v24 = vld [vmem:[#allocation22 + $0x8] sm:$0xff]  ;;  %p3197_p11 = scmp.ne.s32.totalorder %s4119_s21, %s3196_s27  ;;  %p4298_p10 = scmp.ne.s32.totalorder %s4256_s26, 0 }
 0x208   : > { %2487 = vmatprep.subr.msk.bf16.mxu0 %vm4000_vm1, %v2485_v8  ;;  %1151 = vperm.xlu1 %2749, %v1137_v10   ;;  %v1264_v14 = vld [vmem:[#allocation17] sm:$0xff]  ;;  %v1266_v16 = vld [vmem:[#allocation17 + $0x10] sm:$0xff]  ;;  %v861_v18 = vld [vmem:[%s721_s12 + $0x8] sm:$0xff]  ;;  %s3332_s8 = smov [#allocation26]  }
 0x209   : > { %v1131_v19 = vld [vmem:[#allocation13] sm:$0xff]  ;;  %v2292_v20 = vld [vmem:[%s739_s28 + $0x8] sm:$0xff]   ;;  %v1133_v26 = vld [vmem:[#allocation13 + $0x10] sm:$0xff]  ;;  %p3198_p2 = pnand %p3197_p11, %p4298_p10  ;;  %s3200_s30 = sshll.u32 %s3332_s8, 4  ;;  %s3201_s30 = int_to_ptr.vmem [resolvable:$false] %s3200_s30 }
 0x20a   : > { %v956_v21 = vld [vmem:[%s730_s6] sm:$0xff]  ;;  %v957_v22 = vld [vmem:[%s730_s6 + $0x8] sm:$0xff]  ;;  %s2251_s18 = sshll.u32 %s4296_s24, 9  ;;  %s3202_s1 = scalar_lea.vmem %s3201_s30, 1024 }
 0x20b   : > { %1146 = vperm.xlu0 %2748, %v1136_v11   ;;  %v1709_v23 = vld [vmem:[#allocation22] sm:$0xff]  ;;  %v1132_v25 = vld [vmem:[#allocation13 + $0x8] sm:$0xff]  ;;  %v1711_v27 = vld [vmem:[#allocation22 + $0x10] sm:$0xff]  ;;  %v4053_v11 = vshrl.u32 %v983_v1, 7  ;;  %s4125_s9 = scalar_lea.hbm %s4297_s10, %s2251_s18  ;;  %p3199_p12 = pneg %p3198_p2 }
 0x20c   : > { %1156 = vperm.xlu1 %2749, %v1138_v12   ;;  %v1712_v28 = vld [vmem:[#allocation22 + $0x18] sm:$0xff]  ;;  %v1745_v30 = vld [vmem:[#allocation25] sm:$0xff]  ;;  %v1746_v31 = vld [vmem:[#allocation25 + $0x8] sm:$0xff]  ;;  %p3203_p9 = scmp.lt.s32.totalorder %s4119_s21, %s3201_s30  ;;  %p3204_p3 = scmp.lt.s32.totalorder %s3202_s1, %s3196_s27 }
 0x20d   : > { %v1134_v29 = vld [vmem:[#allocation13 + $0x18] sm:$0xff]  ;;  %v1747_v32 = vld [vmem:[#allocation25 + $0x10] sm:$0xff]  ;;  %v1260_v34 = vld [vmem:[#allocation16] sm:$0xff] }
 0x20e   : > { %v1748_v33 = vld [vmem:[#allocation25 + $0x18] sm:$0xff]  ;;  %2397 = vmatprep.mubr.msk.f32.mxu1 %vm986_vm2, %v1260_v34  ;;  %p3205_p4 = por %p3204_p3, %p3203_p9 }
 0x20f   : > { %2490 = vmatpush3.bf16.xpose.msk.msra.mxu0 %vm4000_vm1, %v2485_v8  ;;  %1270 = vperm.xlu0 %2748, %v1264_v14   ;;  %v2220_v43 = vld [vmem:[%s712_s11] ss:$0 sm:$0xff] }
 0x210   : > { %2492 = vmatprep.subr.bf16.mxu0 %v2253_v13  ;;  %1275 = vperm.xlu1 %2749, %v1265_v15   ;;  %p3206_p7 = pnand %p3205_p4, %p3199_p12 }
 0x213   : > { %1280 = vperm.xlu0 %2748, %v1266_v16   ;;  %v2261_v16 = vld [vmem:[%s3972_s2] sm:$0xff]  }
 0x214   : > { %1285 = vperm.xlu1 %2749, %v1267_v17   ;;  %v4057_v17 = vadd.s32 8, %v4053_v11 }
 0x216   : > { %2373 = vmatmul.mubr.msk.f32.vlgmr.msra.gmra.mrb[0].mxu0 %vm862_vm0, %v861_v18 }
 0x217   : > { %2494 = vmatpush3.bf16.msra.mxu0 %v2253_v13  ;;  %2383 = vmatprep.mubr.msk.f32.mxu0 %vm986_vm2, %v1131_v19  ;;  %v1261_v19 = vld [vmem:[#allocation16 + $0x8] sm:$0xff] }
 0x218   : > { %2496 = vmatprep.subr.bf16.mxu0 %v2292_v20  ;;  %961 = vperm.xlu0 %2748, %v956_v21   ;;  %v2293_v21 = vld [vmem:[%s3972_s2 + $0x8] sm:$0xff]  }
 0x219   : > { %966 = vperm.xlu1 %2749, %v957_v22  }
 0x21b   : > { %2498 = vmatpush3.bf16.msra.mxu0 %v2292_v20  ;;  %v1262_v20 = vld [vmem:[#allocation16 + $0x10] sm:$0xff] }
 0x21c   : > { %1715 = vperm.xlu0 %2748, %v1709_v23  }
 0x21d   : > { %1720 = vperm.xlu1 %2749, %v1710_v24  }
 0x21e   : > { %2384 = vmatmul.mubr.msk.f32.vlgmr.msra.gmra.mrb[2].mxu0 %vm986_vm2, %v1132_v25 }
 0x21f   : > { %2386 = vmatprep.mubr.msk.f32.mxu0 %vm986_vm2, %v1133_v26  ;;  %v1263_v26 = vld [vmem:[#allocation16 + $0x18] sm:$0xff] }
 0x220   : > { %1725 = vperm.xlu0 %2748, %v1711_v27   ;;  %v1490_v27 = vld [vmem:[#allocation20] sm:$0xff] }
 0x221   : > { %1730 = vperm.xlu1 %2749, %v1712_v28  }
 0x222   : > { %2387 = vmatmul.mubr.msk.f32.gmra.mrb[4].mxu0 %vm986_vm2, %v1134_v29  ;;  %v2294_v29 = vld [vmem:[%s3972_s2 + $0x10] sm:$0xff]  }
 0x224   : > { %1751 = vperm.xlu0 %2748, %v1745_v30  }
 0x225   : > { %1756 = vperm.xlu1 %2749, %v1746_v31  }
 0x228   : > { %1761 = vperm.xlu0 %2748, %v1747_v32   ;;  %v2295_v32 = vld [vmem:[%s3972_s2 + $0x18] sm:$0xff]  }
 0x229   : > { %1766 = vperm.xlu1 %2749, %v1748_v33  }
 0x286   : > { %v1142_v36 = vpop.permute.xlu0 %1141 }
 0x287   : > { %v1152_v35 = vpop.permute.xlu1 %1151 }
 0x28a   : > { %v1147_v38 = vpop.permute.xlu0 %1146 }
 0x28b   : > { %v1157_v37 = vpop.permute.xlu1 %1156 }
 0x28e   : > { %v4037_v40 = vpop.permute.xlu0 %1270 }
 0x28f   : > { %v4035_v39 = vpop.permute.xlu1 %1275 }
 0x292   : > { %v4041_v42 = vpop.permute.xlu0 %1280 }
 0x293   : > { %v4039_v41 = vpop.permute.xlu1 %1285 }
 0x297   : > { %v962_v45 = vpop.permute.xlu0 %961 }
 0x298   : > { %v967_v44 = vpop.permute.xlu1 %966  ;;  %v975_v47 = vadd.f32 %v2220_v43, %v962_v45 }
 0x299   : > { %v976_v46 = vadd.f32 %v2220_v43, %v967_v44 }
 0x2e9   : > { %v2374_v48 = vpop.f32.mrb[0].mxu0 }
 0x2ea   : > { %v978_v49 = vmul.f32 2.0, %v2374_v48  ;;  %v947_v50 = vpop.f32.mrb[1].mxu0  ;;  %v2297_v48 = vld [vmem:[%s3972_s2 + $0x28] sm:$0xff]  }
 0x2eb   : > { %v977_v51 = vmul.f32 2.0, %v947_v50 }
 0x2ec   : > { %v980_v52 = vsub.f32 %v976_v46, %v978_v49 }
 0x2ed   : > { %v979_v53 = vsub.f32 %v975_v47, %v977_v51 }
 0x2ee   : > { %v4045_v54 = vmax.f32 %v980_v52, 0.0 }
 0x2ef   : > { %v4047_v55 = vmax.f32 %v979_v53, 0.0 }
 0x2f0   : > { %v988_v56 = vsel %vm986_vm2, %v4045_v54, inf }
 0x2f1   : > { %v987_v57 = vsel %vm986_vm2, %v4047_v55, inf  ;;  %v2385_v58 = vpop.f32.mrb[2].mxu0 }
 0x2f2   : > { %v989_v59 = vmin.f32 %v987_v57, %v988_v56  ;;  %v1243_v60 = vadd.f32 %v2385_v58, %v1147_v38  ;;  %v1237_v61 = vpop.f32.mrb[3].mxu0  ;;  %v2296_v38 = vld [vmem:[%s3972_s2 + $0x20] sm:$0xff]   ;;  %v2298_v56 = vld [vmem:[%s3972_s2 + $0x30] sm:$0xff]  }
 0x2f3   : > { %v1238_v62 = vadd.f32 %v1237_v61, %v1142_v36 }
 0x2f4   : > { %v990_v63 = vrot.slane %v989_v59, 4  ;;  %v1257_v0 = vmax.f32 %v1243_v60, 0.0 }
 0x2f5   : > { %v1256_v2 = vmax.f32 %v1238_v62, 0.0  ;;  %v2388_v3 = vpop.f32.mrb[4].mxu0 }
 0x2f6   : > { %v991_v4 = vmin.f32 %v989_v59, %v990_v63  ;;  %v1253_v5 = vadd.f32 %v2388_v3, %v1157_v37  ;;  %v1247_v6 = vpop.f32.mrb[5].mxu0  ;;  %v2299_v59 = vld [vmem:[%s3972_s2 + $0x38] sm:$0xff]  }
 0x2f7   : > { %v1248_v7 = vadd.f32 %v1247_v6, %v1152_v35  ;;  %v2499_v8 = vpack.c.bf16 %v1257_v0, %v1256_v2  ;;  %v1491_v0 = vld [vmem:[#allocation20 + $0x8] sm:$0xff] }
 0x2f8   : > { %v992_v9 = vrot.slane %v991_v4, 2  ;;  %v1259_v10 = vmax.f32 %v1253_v5, 0.0 }
 0x2f9   : > { %v1258_v12 = vmax.f32 %v1248_v7, 0.0  ;;  %2500 = vmatprep.subr.bf16.mxu1 %v2499_v8 }
 0x2fa   : > { %v993_v13 = vmin.f32 %v991_v4, %v992_v9  ;;  %2502 = vmatpush3.bf16.msra.mxu1 %v2499_v8 }
 0x2fb   : > { %v2503_v14 = vpack.c.bf16 %v1259_v10, %v1258_v12 }
 0x2fc   : > { %v994_v15 = vrot.slane %v993_v13, 1 }
 0x2fd   : > { %2504 = vmatprep.subr.bf16.mxu1 %v2503_v14 }
 0x2fe   : > { %v995_v18 = vmin.f32 %v993_v13, %v994_v15  ;;  %2506 = vmatpush3.bf16.msra.mxu1 %v2503_v14 }
 0x2ff   : > { %2516 = vmatprep.subr.bf16.mxu1 %v2261_v16 }
 0x300   : > { %vm996_vm3 = vcmp.eq.f32.partialorder %v4047_v55, %v995_v18  ;;  %vm997_vm4 = vcmp.eq.f32.partialorder %v4045_v54, %v995_v18  ;;  %2750 = vrsqrt.f32 %v995_v18  ;;  %vm1017_vm8 = vcmp.eq.f32.partialorder %v995_v18, inf }
 0x301   : > { %v998_v22 = vsel %vm996_vm3, %v4053_v11, 16  ;;  %v999_v23 = vsel %vm997_vm4, %v4057_v17, 16  ;;  %2398 = vmatmul.mubr.msk.f32.vlgmr.msra.gmra.mrb[0].mxu1 %vm986_vm2, %v1261_v19  ;;  %v1020_v37 = vand.u32 2147483648, %v995_v18  ;;  %vm1019_vm9 = vcmp.eq.f32.partialorder %v995_v18, 0.0 }
 0x302   : > { %v1000_v24 = vsel %vm986_vm2, %v998_v22, 2147483647  ;;  %v1001_v25 = vsel %vm986_vm2, %v999_v23, 2147483647  ;;  %2400 = vmatprep.mubr.msk.f32.mxu1 %vm986_vm2, %v1262_v20  ;;  %2518 = vmatpush3.bf16.msra.mxu1 %v2261_v16 }
 0x303   : > { %vm1002_vm5 = vcmp.lt.s32.totalorder %v1000_v24, %v1001_v25  ;;  %2520 = vmatprep.subr.bf16.mxu1 %v2293_v21 }
 0x304   : > { %v1003_v28 = vsel %vm1002_vm5, %v1000_v24, %v1001_v25 }
 0x305   : > { %v1004_v30 = vrot.slane %v1003_v28, 4  ;;  %2401 = vmatmul.mubr.msk.f32.gmra.mrb[2].mxu1 %vm986_vm2, %v1263_v26 }
 0x306   : > { %2522 = vmatpush3.bf16.msra.mxu1 %v2293_v21  ;;  %2449 = vmatprep.mubr.f32.mxu1 %v1490_v27 }
 0x307   : > { %vm1005_vm6 = vcmp.lt.s32.totalorder %v1003_v28, %v1004_v30  ;;  %2524 = vmatprep.subr.bf16.mxu1 %v2294_v29 }
 0x308   : > { %v1006_v31 = vsel %vm1005_vm6, %v1003_v28, %v1004_v30 }
 0x309   : > { %v1007_v33 = vrot.slane %v1006_v31, 2 }
 0x30a   : > { %v2751_v34 = vpop.eup %2750  ;;  %2526 = vmatpush3.bf16.msra.mxu1 %v2294_v29 }
 0x30b   : > { %vm1008_vm7 = vcmp.lt.s32.totalorder %v1006_v31, %v1007_v33  ;;  %v1016_v35 = vmul.f32 %v2751_v34, %v995_v18  ;;  %2528 = vmatprep.subr.bf16.mxu1 %v2295_v32 }
 0x30c   : > { %v1009_v36 = vsel %vm1008_vm7, %v1006_v31, %v1007_v33 }
 0x30d   : > { %v1010_v43 = vrot.slane %v1009_v36, 1  ;;  %v1018_v44 = vsel %vm1017_vm8, %v995_v18, %v1016_v35 }
 0x30e   : > { %v1021_v45 = vsel %vm1019_vm9, %v1020_v37, %v1018_v44  ;;  %2530 = vmatpush3.bf16.msra.mxu1 %v2295_v32 }
 0x30f   : > { %vm1011_vm10 = vcmp.lt.s32.totalorder %v1009_v36, %v1010_v43  ;;  %v1022_v46 = vadd.f32 1e-08, %v1021_v45  ;;  %2532 = vmatprep.subr.bf16.mxu1 %v2296_v38 }
 0x310   : > { %v1012_v47 = vsel %vm1011_vm10, %v1009_v36, %v1010_v43 }
 0x311   : > { %vm1013_vm11 = vcmp.eq.s32.totalorder %v4053_v11, %v1012_v47  ;;  %vm1014_vm12 = vcmp.eq.s32.totalorder %v4057_v17, %v1012_v47  ;;  %2752 = vrcp.f32 %v1022_v46 }
 0x312   : > { %v1030_v49 = vsel %vm1013_vm11, 1e+30, %v4047_v55  ;;  %v1031_v50 = vsel %vm1014_vm12, 1e+30, %v4045_v54  ;;  %2534 = vmatpush3.bf16.msra.mxu1 %v2296_v38 }
 0x313   : > { %v1032_v51 = vsel %vm986_vm2, %v1030_v49, inf  ;;  %v1033_v52 = vsel %vm986_vm2, %v1031_v50, inf  ;;  %2536 = vmatprep.subr.bf16.mxu1 %v2297_v48 }
 0x314   : > { %v1034_v53 = vmin.f32 %v1032_v51, %v1033_v52 }
 0x316   : > { %v1035_v57 = vrot.slane %v1034_v53, 4  ;;  %2538 = vmatpush3.bf16.msra.mxu1 %v2297_v48 }
 0x317   : > { %2540 = vmatprep.subr.bf16.mxu1 %v2298_v56 }
 0x318   : > { %v1036_v58 = vmin.f32 %v1034_v53, %v1035_v57 }
 0x31a   : > { %v1037_v60 = vrot.slane %v1036_v58, 2  ;;  %2542 = vmatpush3.bf16.msra.mxu1 %v2298_v56 }
 0x31b   : > { %v2753_v55 = vpop.eup %2752  ;;  %2544 = vmatprep.subr.bf16.mxu1 %v2299_v59 }
 0x31c   : > { %v1026_v54 = vsel %vm1013_vm11, %v2753_v55, 0.0  ;;  %v1038_v61 = vmin.f32 %v1036_v58, %v1037_v60  ;;  %v1027_v62 = vsel %vm1014_vm12, %v2753_v55, 0.0 }
 0x31e   : > { %v1039_v63 = vrot.slane %v1038_v61, 1  ;;  %2546 = vmatpush3.bf16.msra.mxu1 %v2299_v59 }
 0x320   : > { %v1040_v1 = vmin.f32 %v1038_v61, %v1039_v63 }
 0x321   : > { %2450 = vmatmul.mubr.f32.vlgmr.msra.gmra.mrb[4].mxu1 %v1491_v0 }
 0x322   : > { %vm1041_vm13 = vcmp.eq.f32.partialorder %v1030_v49, %v1040_v1  ;;  %vm1042_vm14 = vcmp.eq.f32.partialorder %v1031_v50, %v1040_v1  ;;  %2754 = vrsqrt.f32 %v1040_v1  ;;  %vm1062_vm3 = vcmp.eq.f32.partialorder %v1040_v1, inf }
 0x323   : > { %v1043_v2 = vsel %vm1041_vm13, %v4053_v11, 16  ;;  %v1044_v3 = vsel %vm1042_vm14, %v4057_v17, 16  ;;  %v1065_v14 = vand.u32 2147483648, %v1040_v1  ;;  %vm1064_vm4 = vcmp.eq.f32.partialorder %v1040_v1, 0.0 }
 0x324   : > { %v1045_v4 = vsel %vm986_vm2, %v1043_v2, 2147483647  ;;  %v1046_v5 = vsel %vm986_vm2, %v1044_v3, 2147483647  ;;  %v1492_v2 = vld [vmem:[#allocation20 + $0x10] sm:$0xff]  ;;  %v1493_v3 = vld [vmem:[#allocation20 + $0x18] sm:$0xff] }
 0x325   : > { %vm1047_vm15 = vcmp.lt.s32.totalorder %v1045_v4, %v1046_v5  ;;  %2452 = vmatprep.mubr.f32.mxu1 %v1492_v2 }
 0x326   : > { %v1048_v6 = vsel %vm1047_vm15, %v1045_v4, %v1046_v5  ;;  %2453 = vmatmul.mubr.f32.gmra.mrb[6].mxu1 %v1493_v3 }
 0x327   : > { %v1049_v7 = vrot.slane %v1048_v6, 4 }
 0x329   : > { %vm1050_vm0 = vcmp.lt.s32.totalorder %v1048_v6, %v1049_v7 }
 0x32a   : > { %v1051_v8 = vsel %vm1050_vm0, %v1048_v6, %v1049_v7 }
 0x32b   : > { %v1052_v9 = vrot.slane %v1051_v8, 2 }
 0x32c   : > { %v2755_v10 = vpop.eup %2754 }
 0x32d   : > { %vm1053_vm1 = vcmp.lt.s32.totalorder %v1051_v8, %v1052_v9  ;;  %v1061_v12 = vmul.f32 %v2755_v10, %v1040_v1 }
 0x32e   : > { %v1054_v13 = vsel %vm1053_vm1, %v1051_v8, %v1052_v9 }
 0x32f   : > { %v1055_v15 = vrot.slane %v1054_v13, 1  ;;  %v1063_v16 = vsel %vm1062_vm3, %v1040_v1, %v1061_v12  ;;  %v1389_v1 = vld [vmem:[#allocation19] sm:$0xff]  ;;  %vm1611_vm3 = vcmask 130048  }
 0x330   : > { %v1066_v18 = vsel %vm1064_vm4, %v1065_v14, %v1063_v16  ;;  %2411 = vmatprep.mubr.msk.f32.mxu0 %vm986_vm2, %v1389_v1 }
 0x331   : > { %vm1056_vm5 = vcmp.lt.s32.totalorder %v1054_v13, %v1055_v15  ;;  %v1067_v19 = vadd.f32 1e-08, %v1066_v18 }
 0x332   : > { %v1057_v20 = vsel %vm1056_vm5, %v1054_v13, %v1055_v15 }
 0x333   : > { %vm1058_vm6 = vcmp.eq.s32.totalorder %v4053_v11, %v1057_v20  ;;  %vm1059_vm7 = vcmp.eq.s32.totalorder %v4057_v17, %v1057_v20  ;;  %2756 = vrcp.f32 %v1067_v19 }
 0x334   : > { %v1075_v21 = vsel %vm1058_vm6, 1e+30, %v1030_v49  ;;  %v1076_v22 = vsel %vm1059_vm7, 1e+30, %v1031_v50 }
 0x335   : > { %v1077_v23 = vsel %vm986_vm2, %v1075_v21, inf  ;;  %v1078_v24 = vsel %vm986_vm2, %v1076_v22, inf }
 0x336   : > { %v1079_v25 = vmin.f32 %v1077_v23, %v1078_v24 }
 0x338   : > { %v1080_v26 = vrot.slane %v1079_v25, 4 }
 0x33a   : > { %v1081_v27 = vmin.f32 %v1079_v25, %v1080_v26  ;;  %v1741_v25 = vld [vmem:[#allocation23] sm:$0xff]  ;;  %v1721_v26 = vpop.permute.xlu1 %1720 }
 0x33c   : > { %v1082_v28 = vrot.slane %v1081_v27, 2 }
 0x33d   : > { %v2757_v29 = vpop.eup %2756 }
 0x33e   : > { %v1083_v30 = vmin.f32 %v1081_v27, %v1082_v28  ;;  %v1070_v31 = vadd.f32 %v2757_v29, %v2753_v55  ;;  %v1071_v32 = vsel %vm1058_vm6, %v2757_v29, 0.0  ;;  %v1072_v33 = vsel %vm1059_vm7, %v2757_v29, 0.0  ;;  %v1716_v27 = vpop.permute.xlu0 %1715 }
 0x33f   : > { %v1073_v34 = vadd.f32 %v1071_v32, %v1026_v54  ;;  %v1074_v35 = vadd.f32 %v1072_v33, %v1027_v62  ;;  %v1731_v33 = vpop.permute.xlu1 %1730 }
 0x340   : > { %v1084_v36 = vrot.slane %v1083_v30, 1 }
 0x342   : > { %v1085_v37 = vmin.f32 %v1083_v30, %v1084_v36  ;;  %v1726_v36 = vpop.permute.xlu0 %1725 }
 0x344   : > { %vm1086_vm8 = vcmp.eq.f32.partialorder %v1075_v21, %v1085_v37  ;;  %vm1087_vm9 = vcmp.eq.f32.partialorder %v1076_v22, %v1085_v37  ;;  %2758 = vrsqrt.f32 %v1085_v37  ;;  %vm1107_vm13 = vcmp.eq.f32.partialorder %v1085_v37, inf  ;;  %v1391_v22 = vld [vmem:[#allocation19 + $0x10] sm:$0xff] }
 0x345   : > { %v1088_v38 = vsel %vm1086_vm8, %v4053_v11, 16  ;;  %v1089_v43 = vsel %vm1087_vm9, %v4057_v17, 16  ;;  %v1110_v52 = vand.u32 2147483648, %v1085_v37  ;;  %vm1109_vm14 = vcmp.eq.f32.partialorder %v1085_v37, 0.0 }
 0x346   : > { %v1090_v44 = vsel %vm986_vm2, %v1088_v38, 2147483647  ;;  %v1091_v45 = vsel %vm986_vm2, %v1089_v43, 2147483647 }
 0x347   : > { %vm1092_vm10 = vcmp.lt.s32.totalorder %v1090_v44, %v1091_v45 }
 0x348   : > { %v1093_v46 = vsel %vm1092_vm10, %v1090_v44, %v1091_v45 }
 0x349   : > { %v1094_v47 = vrot.slane %v1093_v46, 4 }
 0x34b   : > { %vm1095_vm11 = vcmp.lt.s32.totalorder %v1093_v46, %v1094_v47 }
 0x34c   : > { %v1096_v48 = vsel %vm1095_vm11, %v1093_v46, %v1094_v47 }
 0x34d   : > { %v1097_v49 = vrot.slane %v1096_v48, 2 }
 0x34e   : > { %v2759_v50 = vpop.eup %2758 }
 0x34f   : > { %vm1098_vm12 = vcmp.lt.s32.totalorder %v1096_v48, %v1097_v49  ;;  %v1106_v51 = vmul.f32 %v2759_v50, %v1085_v37  ;;  %v1744_v50 = vld [vmem:[#allocation23 + $0x18] sm:$0xff] }
 0x350   : > { %v1099_v56 = vsel %vm1098_vm12, %v1096_v48, %v1097_v49  ;;  %v1742_v48 = vld [vmem:[#allocation23 + $0x8] sm:$0xff]  ;;  %v1743_v49 = vld [vmem:[#allocation23 + $0x10] sm:$0xff] }
 0x351   : > { %v1108_v53 = vsel %vm1107_vm13, %v1085_v37, %v1106_v51  ;;  %v1100_v59 = vrot.slane %v1099_v56, 1  ;;  %v1757_v51 = vpop.permute.xlu1 %1756 }
 0x352   : > { %v1111_v57 = vsel %vm1109_vm14, %v1110_v52, %v1108_v53  ;;  %v1752_v52 = vpop.permute.xlu0 %1751 }
 0x353   : > { %v1112_v58 = vadd.f32 1e-08, %v1111_v57  ;;  %vm1101_vm15 = vcmp.lt.s32.totalorder %v1099_v56, %v1100_v59 }
 0x354   : > { %v1102_v60 = vsel %vm1101_vm15, %v1099_v56, %v1100_v59 }
 0x355   : > { %2760 = vrcp.f32 %v1112_v58  ;;  %vm1103_vm0 = vcmp.eq.s32.totalorder %v4053_v11, %v1102_v60  ;;  %vm1104_vm1 = vcmp.eq.s32.totalorder %v4057_v17, %v1102_v60  ;;  %v1767_v60 = vpop.permute.xlu1 %1766 }
 0x35f   : > { %v2761_v55 = vpop.eup %2760 }
 0x360   : > { %v1115_v54 = vadd.f32 %v2761_v55, %v1070_v31  ;;  %v1116_v61 = vsel %vm1103_vm0, %v2761_v55, 0.0  ;;  %v1117_v62 = vsel %vm1104_vm1, %v2761_v55, 0.0 }
 0x361   : > { %v1118_v63 = vadd.f32 %v1116_v61, %v1073_v34  ;;  %v1119_v0 = vadd.f32 %v1117_v62, %v1074_v35  ;;  %v1762_v61 = vpop.permute.xlu0 %1761 }
 0x362   : > { %2762 = vrcp.f32 %v1115_v54 }
 0x36c   : > { %v2763_v4 = vpop.eup %2762 }
 0x36d   : > { %v1121_v5 = vmul.f32 %v2763_v4, %v1118_v63  ;;  %v1122_v6 = vmul.f32 %v2763_v4, %v1119_v0 }
 0x36f   : > { %v2547_v7 = vpack.c.bf16 %v1122_v6, %v1121_v5 }
 0x371   : > { %2548 = vmatprep.subr.bf16.mxu1 %v2547_v7 }
 0x372   : > { %2550 = vmatpush3.bf16.msra.mxu1 %v2547_v7 }
 0x3d4   : > { %v2399_v11 = vpop.f32.mrb[0].mxu1 }
 0x3d5   : > { %v1372_v17 = vadd.f32 %v2399_v11, %v4035_v39  ;;  %v1366_v8 = vpop.f32.mrb[1].mxu1  ;;  %v1390_v39 = vld [vmem:[#allocation19 + $0x8] sm:$0xff] }
 0x3d6   : > { %v1367_v9 = vadd.f32 %v1366_v8, %v4037_v40  ;;  %v1392_v40 = vld [vmem:[#allocation19 + $0x18] sm:$0xff] }
 0x3d7   : > { %v1386_v10 = vmax.f32 %v1372_v17, 0.0 }
 0x3d8   : > { %v1385_v12 = vmax.f32 %v1367_v9, 0.0  ;;  %v2402_v13 = vpop.f32.mrb[2].mxu1 }
 0x3d9   : > { %v1382_v14 = vadd.f32 %v2402_v13, %v4039_v41  ;;  %v1376_v15 = vpop.f32.mrb[3].mxu1 }
 0x3da   : > { %v2507_v16 = vpack.c.bf16 %v1386_v10, %v1385_v12  ;;  %v1377_v18 = vadd.f32 %v1376_v15, %v4041_v42 }
 0x3db   : > { %v1388_v19 = vmax.f32 %v1382_v14, 0.0 }
 0x3dc   : > { %v1387_v20 = vmax.f32 %v1377_v18, 0.0  ;;  %2508 = vmatprep.subr.bf16.mxu0 %v2507_v16 }
 0x3dd   : > { %2510 = vmatpush3.bf16.msra.mxu0 %v2507_v16 }
 0x3de   : > { %v2511_v21 = vpack.c.bf16 %v1388_v19, %v1387_v20 }
 0x3e0   : > { %2512 = vmatprep.subr.bf16.mxu0 %v2511_v21 }
 0x3e1   : > { %2514 = vmatpush3.bf16.msra.mxu0 %v2511_v21 }
 0x3e4   : > { %2412 = vmatmul.mubr.msk.f32.vlgmr.msra.gmra.mrb[6].mxu0 %vm986_vm2, %v1390_v39 }
 0x3e5   : > { %2414 = vmatprep.mubr.msk.f32.mxu0 %vm986_vm2, %v1391_v22 }
 0x3e8   : > { %2415 = vmatmul.mubr.msk.f32.gmra.mrb[8].mxu0 %vm986_vm2, %v1392_v40 }
 0x3e9   : > { %2473 = vmatprep.mubr.msk.f32.mxu0 %vm986_vm2, %v1741_v25 }
 0x4b7   : > { %v2413_v41 = vpop.f32.mrb[6].mxu0 }
 0x4b8   : > { %v1471_v23 = vpop.f32.mrb[7].mxu0 }
 0x4b9   : > { %2459 = vmatprep.mubr.msk.f32.mxu1 %vm1611_vm3, %v1471_v23 }
 0x4ba   : > { %2460 = vmatmul.mubr.msk.f32.vlgmr.msra.gmra.mrb[4].mxu1 %vm1611_vm3, %v2413_v41 }
 0x4bb   : > { %v2416_v42 = vpop.f32.mrb[8].mxu0 }
 0x4bc   : > { %v1481_v24 = vpop.f32.mrb[9].mxu0 }
 0x4bd   : > { %2462 = vmatprep.mubr.msk.f32.mxu1 %vm1611_vm3, %v1481_v24 }
 0x4be   : > { %2463 = vmatmul.mubr.msk.f32.gmra.mrb[6].mxu1 %vm1611_vm3, %v2416_v42 }
 0x58d   : > { %v2461_v28 = vpop.f32.mrb[4].mxu1 }
 0x58e   : > { %v1734_v29 = vadd.f32 %v2461_v28, %v1721_v26  ;;  %v1690_v30 = vpop.f32.mrb[5].mxu1 }
 0x58f   : > { %v1733_v31 = vadd.f32 %v1716_v27, %v1690_v30 }
 0x590   : > { %v1738_v32 = vmax.f32 %v1734_v29, 0.0 }
 0x591   : > { %v1737_v34 = vmax.f32 %v1733_v31, 0.0  ;;  %v2464_v35 = vpop.f32.mrb[6].mxu1 }
 0x592   : > { %v1736_v37 = vadd.f32 %v2464_v35, %v1731_v33  ;;  %v1700_v38 = vpop.f32.mrb[7].mxu1 }
 0x593   : > { %v2551_v43 = vpack.c.bf16 %v1738_v32, %v1737_v34  ;;  %v1735_v44 = vadd.f32 %v1726_v36, %v1700_v38 }
 0x594   : > { %v1740_v45 = vmax.f32 %v1736_v37, 0.0 }
 0x595   : > { %v1739_v46 = vmax.f32 %v1735_v44, 0.0  ;;  %2552 = vmatprep.subr.bf16.mxu0 %v2551_v43 }
 0x596   : > { %2554 = vmatpush3.bf16.msra.mxu0 %v2551_v43 }
 0x597   : > { %v2555_v47 = vpack.c.bf16 %v1740_v45, %v1739_v46 }
 0x599   : > { %2556 = vmatprep.subr.bf16.mxu0 %v2555_v47 }
 0x59a   : > { %2558 = vmatpush3.bf16.msra.mxu0 %v2555_v47 }
 0x59d   : > { %2474 = vmatmul.mubr.msk.f32.vlgmr.msra.gmra.mrb[10].mxu0 %vm986_vm2, %v1742_v48 }
 0x59e   : > { %2476 = vmatprep.mubr.msk.f32.mxu0 %vm986_vm2, %v1743_v49 }
 0x5a1   : > { %2477 = vmatmul.mubr.msk.f32.gmra.mrb[12].mxu0 %vm986_vm2, %v1744_v50 }
 0x670   : > { %v2475_v53 = vpop.f32.mrb[10].mxu0 }
 0x671   : > { %v1853_v56 = vadd.f32 %v2475_v53, %v1757_v51  ;;  %v1847_v57 = vpop.f32.mrb[11].mxu0 }
 0x672   : > { %v1848_v58 = vadd.f32 %v1847_v57, %v1752_v52 }
 0x673   : > { %v1867_v59 = vmax.f32 %v1853_v56, 0.0 }
 0x674   : > { %v1866_v55 = vmax.f32 %v1848_v58, 0.0  ;;  %v2478_v54 = vpop.f32.mrb[12].mxu0 }
 0x675   : > { %1871 = vst.msk [vmem:[%s854_s14 + $0x8] sm:$0xff] %vm986_vm2, %v1867_v59  ;;  %v1863_v62 = vadd.f32 %v2478_v54, %v1767_v60  ;;  %v1857_v63 = vpop.f32.mrb[13].mxu0 }
 0x676   : > { %1870 = vst.msk [vmem:[%s854_s14] sm:$0xff] %vm986_vm2, %v1866_v55  ;;  %v1858_v0 = vadd.f32 %v1857_v63, %v1762_v61 }
 0x677   : > { %v1869_v1 = vmax.f32 %v1863_v62, 0.0 }
 0x678   : > { %v1868_v2 = vmax.f32 %v1858_v0, 0.0 }
 0x679   : > { %1873 = vst.msk [vmem:[%s854_s14 + $0x18] sm:$0xff] %vm986_vm2, %v1869_v1 }
 0x67a   : > { %1872 = vst.msk [vmem:[%s854_s14 + $0x10] sm:$0xff] %vm986_vm2, %v1868_v2 }
 0x67b   : > { %3209 = shalt.err (!%p3206_p7)
}
 0x67c   : > { %s3210_s11 = scalar_lea.hbm %s4125_s9, 512  ;;  %s3214_s25 = scalar_lea.hbm %s4297_s10, 1024 }
 0x67d   : > { %p3211_p13 = scmp.ne.s32.totalorder %s4125_s9, %s3210_s11  ;;  %p3215_p1 = scmp.lt.u32.totalorder %s4125_s9, %s4297_s10 }
 0x67e   : > { %p3216_p8 = scmp.lt.u32.totalorder %s3214_s25, %s3210_s11  ;;  %p3218_p11 = scmp.lt.u32.totalorder %s3210_s11, %s4125_s9 }
 0x67f   : > { %p3212_p6 = pnand %p3211_p13, %p4298_p10 }
 0x680   : > { %p3217_p0 = por %p3216_p8, %p3215_p1 }
 0x681   : > { %p3213_p5 = pneg %p3212_p6 }
 0x682   : > { %p3219_p2 = por %p3218_p11, %p3217_p0 }
 0x684   : > { %p3220_p12 = pnand %p3219_p2, %p3213_p5 }
 0x686   : > { %3223 = shalt.err (!%p3220_p12)
}
 0x687   : > { %s3333_s28 = smov 128   ;;  %s3334_s3 = smov 8  }
 0x688   : > { %2611 = dma.vmem_to_hbm [thread:$0]  (%p4298_p10), %s4119_s21, 512, %s4125_s9, %s1875_s20, %s3333_s28, %s3333_s28, %s3334_s3  }
 0x689 PF: > { %s4299_s2 = sld [smem:[#allocation37_spill]]  ;;  %s4300_s24 = sld [smem:[#allocation44_spill]] }
 0x68a   : > { %s4301_s14 = sld [smem:[#allocation40_spill]] }
 0x68f   : > { %s1904_s18 = sand.u32 1, %s4299_s2   ;;  %p4302_p9 = scmp.ne.s32.totalorder %s4300_s24, 0 }
 0x690   : > { %p4303_p3 = scmp.ge.s32.totalorder %s4301_s14, 2  ;;  %s1905_s23 = scalar_lea.sflag [#allocation4], %s1904_s18 }
 0x692   : > { %p2661_p4 = pnand %p4303_p3, %p4302_p9 }
 0x694   : > { %3285 = dma.done.wait (!%p2661_p4), %s1905_s23, 512  }
 0x695   : > { %3287 = vsyncadd (!%p2661_p4), %s1905_s23, 4294966784  ;;  %s44_s23 = sadd.s32 1, %s4301_s14   ;;  %s4304_s16 = sld [smem:[#allocation38_spill]] }
 0x696   : > { %p41_p7 = scmp.ge.s32.totalorder %s44_s23, 4   ;;  %s4305_s20 = sld [smem:[#allocation43_spill]] }
 0x697   : > { %s4306_s26 = sld [smem:[#allocation42_spill]]  ;;  %s4307_s18 = smov %s3294_s19 }
 0x698   : > { %s4309_s21 = smov %s3306_s22  ;;  %43 = sbr.rel (!%p41_p7) target bundleno = 33 (0x21), region = 222 }
 0x69b   : > { %s4308_s19 = smov %s4304_s16 }
 0x69d   : > { %s4310_s22 = smov %s4306_s26 }
 0x69f   :  { %1910 = vsyncpa [#allocation3], 1 }
 0x6a0   :  { %1912 = vsyncpa [#allocation3 + $0x1], 1 }
 0x6a1   :  { %1913 = vsyncpa [#allocation6], 1 }
 0x6a2   :  { %1915 = vsyncpa [#allocation6 + $0x1], 1 }
 0x6a3   :  { %1916 = vsyncpa [#allocation9], 1 }
 0x6a4   :  { %1918 = vsyncpa [#allocation9 + $0x1], 1 }
 0x6a5   :  { %1919 = vsyncpa [#allocation12], 1 }
 0x6a6   :  { %1921 = vsyncpa [#allocation12 + $0x1], 1 }
 0x6a7   :  { %1922 = vsyncpa [#allocation15], 1 }
 0x6a8   :  { %1923 = vsyncpa [#allocation18], 1 }
 0x6a9   :  { %1924 = vsyncpa [#allocation21], 1 }
 0x6aa   :  { %1925 = vsyncpa [#allocation24], 1 }
 0x6ab   :  { %1926 = vsyncpa [#allocation4], 1 }
 0x6ac   :  { %1928 = vsyncpa [#allocation4 + $0x1], 1 }

</bundles_post_ra>
